<compile_context>
chip_gen: v5e
topology: v5e:2x2
jax: 0.10.0
libtpu: 0.0.40
codegen_flags: <defaults>
</compile_context>

<pallas_src>
import numpy as np
import jax
import jax.numpy as jnp
from jax.experimental import pallas as pl
from jax.experimental.pallas import tpu as pltpu

KSIZE = 3    # ConvTranspose2d kernel size (all three layers)
TAP = 128    # lane stride of a fused tap / ih block (vreg-aligned slices)


# ---------------------------------------------------------------------------
# Host-side preprocessing of PyTorch-layout weights (runs once)
# ---------------------------------------------------------------------------
def _fused_tap_mat(w, stride, pad, iw, ow):
    """w: PyTorch ConvTranspose2d weight (Cin, Cout, K, K).
    Returns M_all (IW*Cin, 3*TAP); tap kh lives at lanes [kh*TAP, kh*TAP + OW*Cout):
      M_all[iw*Cin+ci, kh*TAP + ow*Cout+co] = w[ci, co, kh, ow + pad - stride*iw]
    (zero where the implied kw is out of range)."""
    cin, cout = w.shape[0], w.shape[1]
    m = np.zeros((iw * cin, KSIZE * TAP), np.float32)
    for kh in range(KSIZE):
        for i in range(iw):
            for o in range(ow):
                kw = o + pad - stride * i
                if 0 <= kw < KSIZE:
                    m[i * cin:(i + 1) * cin,
                      kh * TAP + o * cout: kh * TAP + (o + 1) * cout] = w[:, :, kh, kw]
    return m


def _unflatten_perm(c=32, h=3, w=3):
    """perm[ih, iw*C + ci] = PyTorch (c, h, w) flat index -> row-slab lane order."""
    perm = np.zeros((h, w * c), np.int64)
    for ih in range(h):
        for iw in range(w):
            for ci in range(c):
                perm[ih, iw * c + ci] = ci * h * w + ih * w + iw
    return perm


def _bias_row(bias, ow):
    return np.tile(np.asarray(bias, np.float32), ow)[None, :]        # (1, OW*C)


def init_params(key, encoded_space_dim):
    """Synthetic parameters in faithful PyTorch layouts (raw) + kernel-ready forms."""
    ks = jax.random.split(key, 14)
    rnd = lambda k, shape, s=0.1: s * np.asarray(jax.random.normal(k, shape, jnp.float32))

    raw = dict(
        w1=rnd(ks[0], (encoded_space_dim, 128)), b1=rnd(ks[1], (1, 128)),
        w2=rnd(ks[2], (128, 3 * 3 * 32)), b2=rnd(ks[3], (3 * 3 * 32,)),
        wt1=rnd(ks[4], (32, 16, 3, 3)), cb1=rnd(ks[5], (16,)),
        g1=1.0 + rnd(ks[6], (16,)), be1=rnd(ks[7], (16,)),
        wt2=rnd(ks[8], (16, 8, 3, 3)), cb2=rnd(ks[9], (8,)),
        g2=1.0 + rnd(ks[10], (8,)), be2=rnd(ks[11], (8,)),
        wt3=rnd(ks[12], (8, 1, 3, 3)), cb3=rnd(ks[13], (1,)),
    )

    # Linear-2 fused with nn.Unflatten: ih-block ih at lanes [ih*TAP, ih*TAP+96).
    perm = _unflatten_perm()
    w2a = np.zeros((128, KSIZE * TAP), np.float32)
    b2a = np.zeros((1, KSIZE * TAP), np.float32)
    for ih in range(3):
        w2a[:, ih * TAP: ih * TAP + 96] = raw["w2"][:, perm[ih]]
        b2a[0, ih * TAP: ih * TAP + 96] = raw["b2"][perm[ih]]

    # ConvTranspose2d lane matrices (taps fused along lanes).
    m1a = _fused_tap_mat(raw["wt1"], 2, 0, 3, 7)       # (96, 384)   32->16
    m2a = _fused_tap_mat(raw["wt2"], 2, 1, 7, 14)      # (112, 384)  16->8
    m3a = _fused_tap_mat(raw["wt3"], 2, 1, 14, 28)     # (112, 384)  8->1 (28 lanes/tap)

    c1b, c2b, c3b = _bias_row(raw["cb1"], 7), _bias_row(raw["cb2"], 14), _bias_row(raw["cb3"], 28)

    # BN per-channel reduce+broadcast over (w, c) lanes: exact 0/1 matrix (bf16-safe),
    # the 1/count scaling is applied as an f32 scalar inside the kernel.
    p1 = np.kron(np.ones((7, 7), np.float32), np.eye(16, dtype=np.float32))
    p2 = np.kron(np.ones((14, 14), np.float32), np.eye(8, dtype=np.float32))
    g1r, be1r = _bias_row(raw["g1"], 7), _bias_row(raw["be1"], 7)
    g2r, be2r = _bias_row(raw["g2"], 14), _bias_row(raw["be2"], 14)

    bf = lambda a: jnp.asarray(a, jnp.bfloat16)   # MXU operands
    f32 = lambda a: jnp.asarray(a, jnp.float32)   # biases / BN affine: exact, v5e-safe
    params = dict(
        w1=bf(raw["w1"]), b1=f32(raw["b1"]), w2a=bf(w2a), b2a=f32(b2a),
        m1a=bf(m1a), c1b=f32(c1b), p1=bf(p1), g1=f32(g1r), be1=f32(be1r),
        m2a=bf(m2a), c2b=f32(c2b), p2=bf(p2), g2=f32(g2r), be2=f32(be2r),
        m3a=bf(m3a), c3b=f32(c3b),
    )
    return params, raw


PARAM_ORDER = ("w1", "b1", "w2a", "b2a",
               "m1a", "c1b", "p1", "g1", "be1",
               "m2a", "c2b", "p2", "g2", "be2",
               "m3a", "c3b")


# ---------------------------------------------------------------------------
# The fused kernel (built per batch size; all loop bounds / offsets are static)
# ---------------------------------------------------------------------------
def _make_kernel(n):
    f32, bf16 = jnp.float32, jnp.bfloat16

    def conv_taps(x_bf, m_ref, b_ref, out_ref, ih, oh, pad, lanes):
        """ConvTranspose2d (stride 2) on the h-major row slab.
        One fused-tap matmul, then static per-output-row block gather+store."""
        yall = jnp.dot(x_bf, m_ref[...], preferred_element_type=f32)   # (ih*n, 3*TAP)
        ys = [yall[:, k * TAP: k * TAP + lanes] for k in range(KSIZE)]
        bias = jnp.broadcast_to(b_ref[...], (n, lanes))                 # hoisted
        for o in range(oh):
            acc = bias
            for kh in range(KSIZE):
                t = o + pad - kh                    # = stride * i
                if t >= 0 and t % 2 == 0 and (t // 2) < ih:
                    i = t // 2
                    acc = acc + ys[kh][i * n:(i + 1) * n, :]
            out_ref[o * n:(o + 1) * n, :] = acc     # each row block written exactly once

    def bn_relu(y, p_ref, g_ref, b_ref, inv_count, eps=1e-5):
        """Training-mode BatchNorm2d (batch mean, biased var) + ReLU.
        Per-channel reduce/broadcast over (w, c) lanes = single bf16 0/1 matmul;
        statistics and elementwise math stay f32 (v5e-safe)."""
        ssum = jnp.sum(y, axis=0, keepdims=True)                        # (1, L) f32
        mean = jnp.dot(ssum.astype(bf16), p_ref[...],
                       preferred_element_type=f32) * inv_count
        d = y - mean
        sq = jnp.sum(d * d, axis=0, keepdims=True)
        var = jnp.dot(sq.astype(bf16), p_ref[...],
                      preferred_element_type=f32) * inv_count
        scale = jax.lax.rsqrt(var + eps) * g_ref[...]                   # (1, L)
        return jnp.maximum(d * scale + b_ref[...], 0.0)

    def kernel(x_ref, w1_ref, b1_ref, w2a_ref, b2a_ref,
               m1_ref, c1b_ref, p1_ref, g1_ref, be1_ref,
               m2_ref, c2b_ref, p2_ref, g2_ref, be2_ref,
               m3_ref, c3b_ref,
               o_ref, feat_ref, c1_ref, c2_ref):
        # decoder_lin: Linear(E,128)+ReLU, Linear(128,288)+ReLU.  The 2nd Linear is
        # emitted per-ih (fused into one 384-lane matmul) directly in the h-major
        # (h*n + b, w*c) row-slab layout -> nn.Unflatten + relayout are free.
        h1 = jnp.dot(x_ref[...], w1_ref[...], preferred_element_type=f32)
        h1 = jnp.maximum(h1 + b1_ref[...], 0.0).astype(jnp.bfloat16)
        y2 = jnp.dot(h1, w2a_ref[...], preferred_element_type=f32)      # (n, 384)
        y2 = jnp.maximum(y2 + b2a_ref[...], 0.0)
        for ihh in range(3):
            feat_ref[ihh * n:(ihh + 1) * n, :] = y2[:, ihh * TAP: ihh * TAP + 96]

        # ConvTranspose2d(32,16,3,s=2) + BN + ReLU            (3n, 96)  -> (7n, 112)
        conv_taps(feat_ref[...].astype(jnp.bfloat16), m1_ref, c1b_ref, c1_ref,
                  ih=3, oh=7, pad=0, lanes=112)
        a1 = bn_relu(c1_ref[...], p1_ref, g1_ref, be1_ref,
                     1.0 / (n * 7 * 7)).astype(jnp.bfloat16)
        # ConvTranspose2d(16,8,3,s=2,p=1,op=1) + BN + ReLU    (7n, 112) -> (14n, 112)
        conv_taps(a1, m2_ref, c2b_ref, c2_ref, ih=7, oh=14, pad=1, lanes=112)
        a2 = bn_relu(c2_ref[...], p2_ref, g2_ref, be2_ref,
                     1.0 / (n * 14 * 14)).astype(jnp.bfloat16)
        # ConvTranspose2d(8,1,3,s=2,p=1,op=1) + sigmoid       (14n, 112) -> (28n, 28)
        conv_taps(a2, m3_ref, c3b_ref, o_ref, ih=14, oh=28, pad=1, lanes=28)
        v = o_ref[...]
        o_ref[...] = 1.0 / (1.0 + jnp.exp(-v))      # exact sigmoid, useful lanes only

    return kernel


# ---------------------------------------------------------------------------
# Wrapper
# ---------------------------------------------------------------------------
def _flops_estimate(n, e):
    mm = lambda m, k, c: 2 * m * k * c
    return int(mm(n, e, 128) + mm(n, 128, 3 * TAP)
               + mm(3 * n, 96, 3 * TAP) + mm(7 * n, 112, 3 * TAP)
               + mm(14 * n, 112, 3 * TAP) + 4 * mm(1, 112, 112))


@jax.jit
def decoder_forward(x, params):
    n, e = x.shape
    args = [x.astype(jnp.bfloat16)] + [params[k] for k in PARAM_ORDER]

    scratch = [pltpu.VMEM((3 * n, 96), jnp.float32),    # MLP output row slab
               pltpu.VMEM((7 * n, 112), jnp.float32),   # conv1 pre-BN
               pltpu.VMEM((14 * n, 112), jnp.float32)]  # conv2 pre-BN
    out_bytes = 28 * n * 28 * 4
    arg_bytes = sum(int(np.prod(a.shape)) * a.dtype.itemsize for a in args)
    scratch_bytes = (3 * n * 96 + 7 * n * 112 + 14 * n * 112) * 4
    vmem_limit = max(2 * (arg_bytes + out_bytes + scratch_bytes), 4 * 1024 * 1024)

    vmem = pl.BlockSpec(memory_space=pltpu.MemorySpace.VMEM)
    out = pl.pallas_call(
        _make_kernel(n),
        out_shape=jax.ShapeDtypeStruct((28 * n, 28), jnp.float32),
        in_specs=[vmem] * len(args),
        out_specs=vmem,
        scratch_shapes=scratch,
        compiler_params=pltpu.CompilerParams(vmem_limit_bytes=int(vmem_limit)),
        cost_estimate=pl.CostEstimate(flops=_flops_estimate(n, e),
                                      transcendentals=28 * 28 * n,
                                      bytes_accessed=int(arg_bytes + out_bytes)),
    )(*args)
    # h-major (28n, 28) row slab -> NCHW (N, 1, 28, 28)
    return out.reshape(28, n, 28).transpose(1, 0, 2).reshape(n, 1, 28, 28)


# ---------------------------------------------------------------------------
# Pure numpy f32 reference (PyTorch semantics) for a correctness check
# ---------------------------------------------------------------------------
def _np_convT(x, w, b, stride, pad, outpad):
    n, cin, ih, iw = x.shape
    cout, k = w.shape[1], w.shape[2]
    oh = (ih - 1) * stride - 2 * pad + k + outpad
    ow = (iw - 1) * stride - 2 * pad + k + outpad
    full = np.zeros((n, cout, (ih - 1) * stride + k, (iw - 1) * stride + k), np.float32)
    for i in range(ih):
        for j in range(iw):
            full[:, :, i * stride:i * stride + k, j * stride:j * stride + k] += np.einsum(
                "nc,cokl->nokl", x[:, :, i, j], w)
    return full[:, :, pad:pad + oh, pad:pad + ow] + b[None, :, None, None]


def _np_bn_relu(x, gamma, beta, eps=1e-5):
    mean = x.mean(axis=(0, 2, 3), keepdims=True)
    var = x.var(axis=(0, 2, 3), keepdims=True)    # biased, training-mode
    y = (x - mean) / np.sqrt(var + eps) * gamma[None, :, None, None] + beta[None, :, None, None]
    return np.maximum(y, 0.0)


def _np_forward(x, raw):
    h = np.maximum(x @ raw["w1"] + raw["b1"], 0.0)
    h = np.maximum(h @ raw["w2"] + raw["b2"], 0.0)
    y = h.reshape(-1, 32, 3, 3)                                  # nn.Unflatten
    y = _np_convT(y, raw["wt1"], raw["cb1"], 2, 0, 0)
    y = _np_bn_relu(y, raw["g1"], raw["be1"])
    y = _np_convT(y, raw["wt2"], raw["cb2"], 2, 1, 1)
    y = _np_bn_relu(y, raw["g2"], raw["be2"])
    y = _np_convT(y, raw["wt3"], raw["cb3"], 2, 1, 1)
    return 1.0 / (1.0 + np.exp(-y))


if __name__ == "__main__":
    encoded_space_dim = 8
    batch = 2

    key = jax.random.PRNGKey(0)
    kx, kp = jax.random.split(key)
    x = jax.random.normal(kx, (batch, encoded_space_dim), jnp.float32)
    params, raw = init_params(kp, encoded_space_dim)

    out = jax.block_until_ready(decoder_forward(x, params))
    assert out.shape == (batch, 1, 28, 28), out.shape
    assert bool(jnp.all(jnp.isfinite(out)))
    assert bool(jnp.all((out >= 0.0) & (out <= 1.0)))            # sigmoid range

    ref = _np_forward(np.asarray(x, np.float32), raw)
    err = float(np.max(np.abs(np.asarray(out, np.float32) - ref)))
    assert err < 0.1, f"max abs diff vs f32 reference too large: {err}"

    print("KERNEL_OK")
</pallas_src>

<mosaic_0001>
module attributes {stable_mosaic.version = 11 : i64} {
  func.func @kernel(%arg0: memref<2x8xbf16, #tpu.memory_space<vmem>>, %arg1: memref<8x128xbf16, #tpu.memory_space<vmem>>, %arg2: memref<1x128xf32, #tpu.memory_space<vmem>>, %arg3: memref<128x384xbf16, #tpu.memory_space<vmem>>, %arg4: memref<1x384xf32, #tpu.memory_space<vmem>>, %arg5: memref<96x384xbf16, #tpu.memory_space<vmem>>, %arg6: memref<1x112xf32, #tpu.memory_space<vmem>>, %arg7: memref<112x112xbf16, #tpu.memory_space<vmem>>, %arg8: memref<1x112xf32, #tpu.memory_space<vmem>>, %arg9: memref<1x112xf32, #tpu.memory_space<vmem>>, %arg10: memref<112x384xbf16, #tpu.memory_space<vmem>>, %arg11: memref<1x112xf32, #tpu.memory_space<vmem>>, %arg12: memref<112x112xbf16, #tpu.memory_space<vmem>>, %arg13: memref<1x112xf32, #tpu.memory_space<vmem>>, %arg14: memref<1x112xf32, #tpu.memory_space<vmem>>, %arg15: memref<112x384xbf16, #tpu.memory_space<vmem>>, %arg16: memref<1x28xf32, #tpu.memory_space<vmem>>, %arg17: memref<56x28xf32, #tpu.memory_space<vmem>>, %arg18: memref<6x96xf32, #tpu.memory_space<vmem>>, %arg19: memref<14x112xf32, #tpu.memory_space<vmem>>, %arg20: memref<28x112xf32, #tpu.memory_space<vmem>>) attributes {dimension_semantics = [], scalar_prefetch = 0 : i64, scratch_operands = 3 : i64, tpu.core_type = #tpu.core_type<tc>} {
    %c0 = arith.constant 0 : index
    %c0_0 = arith.constant 0 : index
    %0 = vector.load %arg0[%c0, %c0_0] : memref<2x8xbf16, #tpu.memory_space<vmem>>, vector<2x8xbf16>
    %c0_1 = arith.constant 0 : index
    %c0_2 = arith.constant 0 : index
    %1 = vector.load %arg1[%c0_1, %c0_2] : memref<8x128xbf16, #tpu.memory_space<vmem>>, vector<8x128xbf16>
    %cst = arith.constant dense<0.000000e+00> : vector<2x128xf32>
    %2 = tpu.matmul %0, %1, %cst {dimension_numbers = #tpu.dot_dimension_numbers<[1], [0], [0], [1], [0, 0, 1, 1], [], []>} : vector<2x8xbf16>, vector<8x128xbf16>, vector<2x128xf32> -> vector<2x128xf32>
    %c0_3 = arith.constant 0 : index
    %c0_4 = arith.constant 0 : index
    %3 = vector.load %arg2[%c0_3, %c0_4] : memref<1x128xf32, #tpu.memory_space<vmem>>, vector<1x128xf32>
    %4 = vector.broadcast %3 : vector<1x128xf32> to vector<2x128xf32>
    %5 = arith.addf %2, %4 : vector<2x128xf32>
    %cst_5 = arith.constant 0.000000e+00 : f32
    %6 = vector.broadcast %cst_5 : f32 to vector<2x128xf32>
    %7 = arith.maximumf %5, %6 : vector<2x128xf32>
    %8 = arith.truncf %7 : vector<2x128xf32> to vector<2x128xbf16>
    %c0_6 = arith.constant 0 : index
    %c0_7 = arith.constant 0 : index
    %9 = vector.load %arg3[%c0_6, %c0_7] : memref<128x384xbf16, #tpu.memory_space<vmem>>, vector<128x384xbf16>
    %cst_8 = arith.constant dense<0.000000e+00> : vector<2x384xf32>
    %10 = tpu.matmul %8, %9, %cst_8 {dimension_numbers = #tpu.dot_dimension_numbers<[1], [0], [0], [1], [0, 0, 1, 1], [], []>} : vector<2x128xbf16>, vector<128x384xbf16>, vector<2x384xf32> -> vector<2x384xf32>
    %c0_9 = arith.constant 0 : index
    %c0_10 = arith.constant 0 : index
    %11 = vector.load %arg4[%c0_9, %c0_10] : memref<1x384xf32, #tpu.memory_space<vmem>>, vector<1x384xf32>
    %12 = vector.broadcast %11 : vector<1x384xf32> to vector<2x384xf32>
    %13 = arith.addf %10, %12 : vector<2x384xf32>
    %cst_11 = arith.constant 0.000000e+00 : f32
    %14 = vector.broadcast %cst_11 : f32 to vector<2x384xf32>
    %15 = arith.maximumf %13, %14 : vector<2x384xf32>
    %16 = vector.extract_strided_slice %15 {offsets = [0, 0], sizes = [2, 96], strides = [1, 1]} : vector<2x384xf32> to vector<2x96xf32>
    %c0_12 = arith.constant 0 : index
    %c0_13 = arith.constant 0 : index
    %17 = vector.load %arg18[%c0_12, %c0_13] : memref<6x96xf32, #tpu.memory_space<vmem>>, vector<2x96xf32>
    tpu.vector_store %arg18[%c0_12, %c0_13], %16 {strides = array<i32>} : memref<6x96xf32, #tpu.memory_space<vmem>>, vector<2x96xf32>,
    %18 = vector.extract_strided_slice %15 {offsets = [0, 128], sizes = [2, 96], strides = [1, 1]} : vector<2x384xf32> to vector<2x96xf32>
    %c2 = arith.constant 2 : index
    %c0_14 = arith.constant 0 : index
    %19 = vector.load %arg18[%c2, %c0_14] : memref<6x96xf32, #tpu.memory_space<vmem>>, vector<2x96xf32>
    tpu.vector_store %arg18[%c2, %c0_14], %18 {strides = array<i32>} : memref<6x96xf32, #tpu.memory_space<vmem>>, vector<2x96xf32>,
    %20 = vector.extract_strided_slice %15 {offsets = [0, 256], sizes = [2, 96], strides = [1, 1]} : vector<2x384xf32> to vector<2x96xf32>
    %c4 = arith.constant 4 : index
    %c0_15 = arith.constant 0 : index
    %21 = vector.load %arg18[%c4, %c0_15] : memref<6x96xf32, #tpu.memory_space<vmem>>, vector<2x96xf32>
    tpu.vector_store %arg18[%c4, %c0_15], %20 {strides = array<i32>} : memref<6x96xf32, #tpu.memory_space<vmem>>, vector<2x96xf32>,
    %c0_16 = arith.constant 0 : index
    %c0_17 = arith.constant 0 : index
    %22 = vector.load %arg18[%c0_16, %c0_17] : memref<6x96xf32, #tpu.memory_space<vmem>>, vector<6x96xf32>
    %23 = arith.truncf %22 : vector<6x96xf32> to vector<6x96xbf16>
    %c0_18 = arith.constant 0 : index
    %c0_19 = arith.constant 0 : index
    %24 = vector.load %arg5[%c0_18, %c0_19] : memref<96x384xbf16, #tpu.memory_space<vmem>>, vector<96x384xbf16>
    %cst_20 = arith.constant dense<0.000000e+00> : vector<6x384xf32>
    %25 = tpu.matmul %23, %24, %cst_20 {dimension_numbers = #tpu.dot_dimension_numbers<[1], [0], [0], [1], [0, 0, 1, 1], [], []>} : vector<6x96xbf16>, vector<96x384xbf16>, vector<6x384xf32> -> vector<6x384xf32>
    %26 = vector.extract_strided_slice %25 {offsets = [0, 0], sizes = [6, 112], strides = [1, 1]} : vector<6x384xf32> to vector<6x112xf32>
    %27 = vector.extract_strided_slice %25 {offsets = [0, 128], sizes = [6, 112], strides = [1, 1]} : vector<6x384xf32> to vector<6x112xf32>
    %28 = vector.extract_strided_slice %25 {offsets = [0, 256], sizes = [6, 112], strides = [1, 1]} : vector<6x384xf32> to vector<6x112xf32>
    %c0_21 = arith.constant 0 : index
    %c0_22 = arith.constant 0 : index
    %29 = vector.load %arg6[%c0_21, %c0_22] : memref<1x112xf32, #tpu.memory_space<vmem>>, vector<1x112xf32>
    %30 = vector.shape_cast %29 : vector<1x112xf32> to vector<1x112xf32>
    %31 = vector.broadcast %30 : vector<1x112xf32> to vector<2x112xf32>
    %32 = vector.extract_strided_slice %26 {offsets = [0, 0], sizes = [2, 112], strides = [1, 1]} : vector<6x112xf32> to vector<2x112xf32>
    %33 = arith.addf %31, %32 : vector<2x112xf32>
    %c0_23 = arith.constant 0 : index
    %c0_24 = arith.constant 0 : index
    %34 = vector.load %arg19[%c0_23, %c0_24] : memref<14x112xf32, #tpu.memory_space<vmem>>, vector<2x112xf32>
    tpu.vector_store %arg19[%c0_23, %c0_24], %33 {strides = array<i32>} : memref<14x112xf32, #tpu.memory_space<vmem>>, vector<2x112xf32>,
    %35 = vector.extract_strided_slice %27 {offsets = [0, 0], sizes = [2, 112], strides = [1, 1]} : vector<6x112xf32> to vector<2x112xf32>
    %36 = arith.addf %31, %35 : vector<2x112xf32>
    %c2_25 = arith.constant 2 : index
    %c0_26 = arith.constant 0 : index
    %37 = vector.load %arg19[%c2_25, %c0_26] : memref<14x112xf32, #tpu.memory_space<vmem>>, vector<2x112xf32>
    tpu.vector_store %arg19[%c2_25, %c0_26], %36 {strides = array<i32>} : memref<14x112xf32, #tpu.memory_space<vmem>>, vector<2x112xf32>,
    %38 = vector.extract_strided_slice %26 {offsets = [2, 0], sizes = [2, 112], strides = [1, 1]} : vector<6x112xf32> to vector<2x112xf32>
    %39 = arith.addf %31, %38 : vector<2x112xf32>
    %40 = vector.extract_strided_slice %28 {offsets = [0, 0], sizes = [2, 112], strides = [1, 1]} : vector<6x112xf32> to vector<2x112xf32>
    %41 = arith.addf %39, %40 : vector<2x112xf32>
    %c4_27 = arith.constant 4 : index
    %c0_28 = arith.constant 0 : index
    %42 = vector.load %arg19[%c4_27, %c0_28] : memref<14x112xf32, #tpu.memory_space<vmem>>, vector<2x112xf32>
    tpu.vector_store %arg19[%c4_27, %c0_28], %41 {strides = array<i32>} : memref<14x112xf32, #tpu.memory_space<vmem>>, vector<2x112xf32>,
    %43 = vector.extract_strided_slice %27 {offsets = [2, 0], sizes = [2, 112], strides = [1, 1]} : vector<6x112xf32> to vector<2x112xf32>
    %44 = arith.addf %31, %43 : vector<2x112xf32>
    %c6 = arith.constant 6 : index
    %c0_29 = arith.constant 0 : index
    %45 = vector.load %arg19[%c6, %c0_29] : memref<14x112xf32, #tpu.memory_space<vmem>>, vector<2x112xf32>
    tpu.vector_store %arg19[%c6, %c0_29], %44 {strides = array<i32>} : memref<14x112xf32, #tpu.memory_space<vmem>>, vector<2x112xf32>,
    %46 = vector.extract_strided_slice %26 {offsets = [4, 0], sizes = [2, 112], strides = [1, 1]} : vector<6x112xf32> to vector<2x112xf32>
    %47 = arith.addf %31, %46 : vector<2x112xf32>
    %48 = vector.extract_strided_slice %28 {offsets = [2, 0], sizes = [2, 112], strides = [1, 1]} : vector<6x112xf32> to vector<2x112xf32>
    %49 = arith.addf %47, %48 : vector<2x112xf32>
    %c8 = arith.constant 8 : index
    %c0_30 = arith.constant 0 : index
    %50 = vector.load %arg19[%c8, %c0_30] : memref<14x112xf32, #tpu.memory_space<vmem>>, vector<2x112xf32>
    tpu.vector_store %arg19[%c8, %c0_30], %49 {strides = array<i32>} : memref<14x112xf32, #tpu.memory_space<vmem>>, vector<2x112xf32>,
    %51 = vector.extract_strided_slice %27 {offsets = [4, 0], sizes = [2, 112], strides = [1, 1]} : vector<6x112xf32> to vector<2x112xf32>
    %52 = arith.addf %31, %51 : vector<2x112xf32>
    %c10 = arith.constant 10 : index
    %c0_31 = arith.constant 0 : index
    %53 = vector.load %arg19[%c10, %c0_31] : memref<14x112xf32, #tpu.memory_space<vmem>>, vector<2x112xf32>
    tpu.vector_store %arg19[%c10, %c0_31], %52 {strides = array<i32>} : memref<14x112xf32, #tpu.memory_space<vmem>>, vector<2x112xf32>,
    %54 = vector.extract_strided_slice %28 {offsets = [4, 0], sizes = [2, 112], strides = [1, 1]} : vector<6x112xf32> to vector<2x112xf32>
    %55 = arith.addf %31, %54 : vector<2x112xf32>
    %c12 = arith.constant 12 : index
    %c0_32 = arith.constant 0 : index
    %56 = vector.load %arg19[%c12, %c0_32] : memref<14x112xf32, #tpu.memory_space<vmem>>, vector<2x112xf32>
    tpu.vector_store %arg19[%c12, %c0_32], %55 {strides = array<i32>} : memref<14x112xf32, #tpu.memory_space<vmem>>, vector<2x112xf32>,
    %c0_33 = arith.constant 0 : index
    %c0_34 = arith.constant 0 : index
    %57 = vector.load %arg19[%c0_33, %c0_34] : memref<14x112xf32, #tpu.memory_space<vmem>>, vector<14x112xf32>
    %cst_35 = arith.constant dense<0.000000e+00> : vector<112xf32>
    %58 = vector.multi_reduction <add>, %57, %cst_35 [0] : vector<14x112xf32> to vector<112xf32>
    %59 = vector.shape_cast %58 : vector<112xf32> to vector<1x112xf32>
    %60 = arith.truncf %59 : vector<1x112xf32> to vector<1x112xbf16>
    %c0_36 = arith.constant 0 : index
    %c0_37 = arith.constant 0 : index
    %61 = vector.load %arg7[%c0_36, %c0_37] : memref<112x112xbf16, #tpu.memory_space<vmem>>, vector<112x112xbf16>
    %cst_38 = arith.constant dense<0.000000e+00> : vector<1x112xf32>
    %62 = tpu.matmul %60, %61, %cst_38 {dimension_numbers = #tpu.dot_dimension_numbers<[1], [0], [0], [1], [0, 0, 1, 1], [], []>} : vector<1x112xbf16>, vector<112x112xbf16>, vector<1x112xf32> -> vector<1x112xf32>
    %cst_39 = arith.constant 0.0102040814 : f32
    %63 = vector.broadcast %cst_39 : f32 to vector<1x112xf32>
    %64 = arith.mulf %62, %63 : vector<1x112xf32>
    %65 = vector.broadcast %64 : vector<1x112xf32> to vector<14x112xf32>
    %66 = arith.subf %57, %65 : vector<14x112xf32>
    %67 = arith.mulf %66, %66 : vector<14x112xf32>
    %cst_40 = arith.constant dense<0.000000e+00> : vector<112xf32>
    %68 = vector.multi_reduction <add>, %67, %cst_40 [0] : vector<14x112xf32> to vector<112xf32>
    %69 = vector.shape_cast %68 : vector<112xf32> to vector<1x112xf32>
    %70 = arith.truncf %69 : vector<1x112xf32> to vector<1x112xbf16>
    %c0_41 = arith.constant 0 : index
    %c0_42 = arith.constant 0 : index
    %71 = vector.load %arg7[%c0_41, %c0_42] : memref<112x112xbf16, #tpu.memory_space<vmem>>, vector<112x112xbf16>
    %cst_43 = arith.constant dense<0.000000e+00> : vector<1x112xf32>
    %72 = tpu.matmul %70, %71, %cst_43 {dimension_numbers = #tpu.dot_dimension_numbers<[1], [0], [0], [1], [0, 0, 1, 1], [], []>} : vector<1x112xbf16>, vector<112x112xbf16>, vector<1x112xf32> -> vector<1x112xf32>
    %cst_44 = arith.constant 0.0102040814 : f32
    %73 = vector.broadcast %cst_44 : f32 to vector<1x112xf32>
    %74 = arith.mulf %72, %73 : vector<1x112xf32>
    %cst_45 = arith.constant 9.99999974E-6 : f32
    %75 = vector.broadcast %cst_45 : f32 to vector<1x112xf32>
    %76 = arith.addf %74, %75 : vector<1x112xf32>
    %77 = math.rsqrt %76 : vector<1x112xf32>
    %c0_46 = arith.constant 0 : index
    %c0_47 = arith.constant 0 : index
    %78 = vector.load %arg8[%c0_46, %c0_47] : memref<1x112xf32, #tpu.memory_space<vmem>>, vector<1x112xf32>
    %79 = arith.mulf %77, %78 : vector<1x112xf32>
    %80 = vector.broadcast %79 : vector<1x112xf32> to vector<14x112xf32>
    %81 = arith.mulf %66, %80 : vector<14x112xf32>
    %c0_48 = arith.constant 0 : index
    %c0_49 = arith.constant 0 : index
    %82 = vector.load %arg9[%c0_48, %c0_49] : memref<1x112xf32, #tpu.memory_space<vmem>>, vector<1x112xf32>
    %83 = vector.broadcast %82 : vector<1x112xf32> to vector<14x112xf32>
    %84 = arith.addf %81, %83 : vector<14x112xf32>
    %cst_50 = arith.constant 0.000000e+00 : f32
    %85 = vector.broadcast %cst_50 : f32 to vector<14x112xf32>
    %86 = arith.maximumf %84, %85 : vector<14x112xf32>
    %87 = arith.truncf %86 : vector<14x112xf32> to vector<14x112xbf16>
    %c0_51 = arith.constant 0 : index
    %c0_52 = arith.constant 0 : index
    %88 = vector.load %arg10[%c0_51, %c0_52] : memref<112x384xbf16, #tpu.memory_space<vmem>>, vector<112x384xbf16>
    %cst_53 = arith.constant dense<0.000000e+00> : vector<14x384xf32>
    %89 = tpu.matmul %87, %88, %cst_53 {dimension_numbers = #tpu.dot_dimension_numbers<[1], [0], [0], [1], [0, 0, 1, 1], [], []>} : vector<14x112xbf16>, vector<112x384xbf16>, vector<14x384xf32> -> vector<14x384xf32>
    %90 = vector.extract_strided_slice %89 {offsets = [0, 0], sizes = [14, 112], strides = [1, 1]} : vector<14x384xf32> to vector<14x112xf32>
    %91 = vector.extract_strided_slice %89 {offsets = [0, 128], sizes = [14, 112], strides = [1, 1]} : vector<14x384xf32> to vector<14x112xf32>
    %92 = vector.extract_strided_slice %89 {offsets = [0, 256], sizes = [14, 112], strides = [1, 1]} : vector<14x384xf32> to vector<14x112xf32>
    %c0_54 = arith.constant 0 : index
    %c0_55 = arith.constant 0 : index
    %93 = vector.load %arg11[%c0_54, %c0_55] : memref<1x112xf32, #tpu.memory_space<vmem>>, vector<1x112xf32>
    %94 = vector.shape_cast %93 : vector<1x112xf32> to vector<1x112xf32>
    %95 = vector.broadcast %94 : vector<1x112xf32> to vector<2x112xf32>
    %96 = vector.extract_strided_slice %91 {offsets = [0, 0], sizes = [2, 112], strides = [1, 1]} : vector<14x112xf32> to vector<2x112xf32>
    %97 = arith.addf %95, %96 : vector<2x112xf32>
    %c0_56 = arith.constant 0 : index
    %c0_57 = arith.constant 0 : index
    %98 = vector.load %arg20[%c0_56, %c0_57] : memref<28x112xf32, #tpu.memory_space<vmem>>, vector<2x112xf32>
    tpu.vector_store %arg20[%c0_56, %c0_57], %97 {strides = array<i32>} : memref<28x112xf32, #tpu.memory_space<vmem>>, vector<2x112xf32>,
    %99 = vector.extract_strided_slice %90 {offsets = [2, 0], sizes = [2, 112], strides = [1, 1]} : vector<14x112xf32> to vector<2x112xf32>
    %100 = arith.addf %95, %99 : vector<2x112xf32>
    %101 = vector.extract_strided_slice %92 {offsets = [0, 0], sizes = [2, 112], strides = [1, 1]} : vector<14x112xf32> to vector<2x112xf32>
    %102 = arith.addf %100, %101 : vector<2x112xf32>
    %c2_58 = arith.constant 2 : index
    %c0_59 = arith.constant 0 : index
    %103 = vector.load %arg20[%c2_58, %c0_59] : memref<28x112xf32, #tpu.memory_space<vmem>>, vector<2x112xf32>
    tpu.vector_store %arg20[%c2_58, %c0_59], %102 {strides = array<i32>} : memref<28x112xf32, #tpu.memory_space<vmem>>, vector<2x112xf32>,
    %104 = vector.extract_strided_slice %91 {offsets = [2, 0], sizes = [2, 112], strides = [1, 1]} : vector<14x112xf32> to vector<2x112xf32>
    %105 = arith.addf %95, %104 : vector<2x112xf32>
    %c4_60 = arith.constant 4 : index
    %c0_61 = arith.constant 0 : index
    %106 = vector.load %arg20[%c4_60, %c0_61] : memref<28x112xf32, #tpu.memory_space<vmem>>, vector<2x112xf32>
    tpu.vector_store %arg20[%c4_60, %c0_61], %105 {strides = array<i32>} : memref<28x112xf32, #tpu.memory_space<vmem>>, vector<2x112xf32>,
    %107 = vector.extract_strided_slice %90 {offsets = [4, 0], sizes = [2, 112], strides = [1, 1]} : vector<14x112xf32> to vector<2x112xf32>
    %108 = arith.addf %95, %107 : vector<2x112xf32>
    %109 = vector.extract_strided_slice %92 {offsets = [2, 0], sizes = [2, 112], strides = [1, 1]} : vector<14x112xf32> to vector<2x112xf32>
    %110 = arith.addf %108, %109 : vector<2x112xf32>
    %c6_62 = arith.constant 6 : index
    %c0_63 = arith.constant 0 : index
    %111 = vector.load %arg20[%c6_62, %c0_63] : memref<28x112xf32, #tpu.memory_space<vmem>>, vector<2x112xf32>
    tpu.vector_store %arg20[%c6_62, %c0_63], %110 {strides = array<i32>} : memref<28x112xf32, #tpu.memory_space<vmem>>, vector<2x112xf32>,
    %112 = vector.extract_strided_slice %91 {offsets = [4, 0], sizes = [2, 112], strides = [1, 1]} : vector<14x112xf32> to vector<2x112xf32>
    %113 = arith.addf %95, %112 : vector<2x112xf32>
    %c8_64 = arith.constant 8 : index
    %c0_65 = arith.constant 0 : index
    %114 = vector.load %arg20[%c8_64, %c0_65] : memref<28x112xf32, #tpu.memory_space<vmem>>, vector<2x112xf32>
    tpu.vector_store %arg20[%c8_64, %c0_65], %113 {strides = array<i32>} : memref<28x112xf32, #tpu.memory_space<vmem>>, vector<2x112xf32>,
    %115 = vector.extract_strided_slice %90 {offsets = [6, 0], sizes = [2, 112], strides = [1, 1]} : vector<14x112xf32> to vector<2x112xf32>
    %116 = arith.addf %95, %115 : vector<2x112xf32>
    %117 = vector.extract_strided_slice %92 {offsets = [4, 0], sizes = [2, 112], strides = [1, 1]} : vector<14x112xf32> to vector<2x112xf32>
    %118 = arith.addf %116, %117 : vector<2x112xf32>
    %c10_66 = arith.constant 10 : index
    %c0_67 = arith.constant 0 : index
    %119 = vector.load %arg20[%c10_66, %c0_67] : memref<28x112xf32, #tpu.memory_space<vmem>>, vector<2x112xf32>
    tpu.vector_store %arg20[%c10_66, %c0_67], %118 {strides = array<i32>} : memref<28x112xf32, #tpu.memory_space<vmem>>, vector<2x112xf32>,
    %120 = vector.extract_strided_slice %91 {offsets = [6, 0], sizes = [2, 112], strides = [1, 1]} : vector<14x112xf32> to vector<2x112xf32>
    %121 = arith.addf %95, %120 : vector<2x112xf32>
    %c12_68 = arith.constant 12 : index
    %c0_69 = arith.constant 0 : index
    %122 = vector.load %arg20[%c12_68, %c0_69] : memref<28x112xf32, #tpu.memory_space<vmem>>, vector<2x112xf32>
    tpu.vector_store %arg20[%c12_68, %c0_69], %121 {strides = array<i32>} : memref<28x112xf32, #tpu.memory_space<vmem>>, vector<2x112xf32>,
    %123 = vector.extract_strided_slice %90 {offsets = [8, 0], sizes = [2, 112], strides = [1, 1]} : vector<14x112xf32> to vector<2x112xf32>
    %124 = arith.addf %95, %123 : vector<2x112xf32>
    %125 = vector.extract_strided_slice %92 {offsets = [6, 0], sizes = [2, 112], strides = [1, 1]} : vector<14x112xf32> to vector<2x112xf32>
    %126 = arith.addf %124, %125 : vector<2x112xf32>
    %c14 = arith.constant 14 : index
    %c0_70 = arith.constant 0 : index
    %127 = vector.load %arg20[%c14, %c0_70] : memref<28x112xf32, #tpu.memory_space<vmem>>, vector<2x112xf32>
    tpu.vector_store %arg20[%c14, %c0_70], %126 {strides = array<i32>} : memref<28x112xf32, #tpu.memory_space<vmem>>, vector<2x112xf32>,
    %128 = vector.extract_strided_slice %91 {offsets = [8, 0], sizes = [2, 112], strides = [1, 1]} : vector<14x112xf32> to vector<2x112xf32>
    %129 = arith.addf %95, %128 : vector<2x112xf32>
    %c16 = arith.constant 16 : index
    %c0_71 = arith.constant 0 : index
    %130 = vector.load %arg20[%c16, %c0_71] : memref<28x112xf32, #tpu.memory_space<vmem>>, vector<2x112xf32>
    tpu.vector_store %arg20[%c16, %c0_71], %129 {strides = array<i32>} : memref<28x112xf32, #tpu.memory_space<vmem>>, vector<2x112xf32>,
    %131 = vector.extract_strided_slice %90 {offsets = [10, 0], sizes = [2, 112], strides = [1, 1]} : vector<14x112xf32> to vector<2x112xf32>
    %132 = arith.addf %95, %131 : vector<2x112xf32>
    %133 = vector.extract_strided_slice %92 {offsets = [8, 0], sizes = [2, 112], strides = [1, 1]} : vector<14x112xf32> to vector<2x112xf32>
    %134 = arith.addf %132, %133 : vector<2x112xf32>
    %c18 = arith.constant 18 : index
    %c0_72 = arith.constant 0 : index
    %135 = vector.load %arg20[%c18, %c0_72] : memref<28x112xf32, #tpu.memory_space<vmem>>, vector<2x112xf32>
    tpu.vector_store %arg20[%c18, %c0_72], %134 {strides = array<i32>} : memref<28x112xf32, #tpu.memory_space<vmem>>, vector<2x112xf32>,
    %136 = vector.extract_strided_slice %91 {offsets = [10, 0], sizes = [2, 112], strides = [1, 1]} : vector<14x112xf32> to vector<2x112xf32>
    %137 = arith.addf %95, %136 : vector<2x112xf32>
    %c20 = arith.constant 20 : index
    %c0_73 = arith.constant 0 : index
    %138 = vector.load %arg20[%c20, %c0_73] : memref<28x112xf32, #tpu.memory_space<vmem>>, vector<2x112xf32>
    tpu.vector_store %arg20[%c20, %c0_73], %137 {strides = array<i32>} : memref<28x112xf32, #tpu.memory_space<vmem>>, vector<2x112xf32>,
    %139 = vector.extract_strided_slice %90 {offsets = [12, 0], sizes = [2, 112], strides = [1, 1]} : vector<14x112xf32> to vector<2x112xf32>
    %140 = arith.addf %95, %139 : vector<2x112xf32>
    %141 = vector.extract_strided_slice %92 {offsets = [10, 0], sizes = [2, 112], strides = [1, 1]} : vector<14x112xf32> to vector<2x112xf32>
    %142 = arith.addf %140, %141 : vector<2x112xf32>
    %c22 = arith.constant 22 : index
    %c0_74 = arith.constant 0 : index
    %143 = vector.load %arg20[%c22, %c0_74] : memref<28x112xf32, #tpu.memory_space<vmem>>, vector<2x112xf32>
    tpu.vector_store %arg20[%c22, %c0_74], %142 {strides = array<i32>} : memref<28x112xf32, #tpu.memory_space<vmem>>, vector<2x112xf32>,
    %144 = vector.extract_strided_slice %91 {offsets = [12, 0], sizes = [2, 112], strides = [1, 1]} : vector<14x112xf32> to vector<2x112xf32>
    %145 = arith.addf %95, %144 : vector<2x112xf32>
    %c24 = arith.constant 24 : index
    %c0_75 = arith.constant 0 : index
    %146 = vector.load %arg20[%c24, %c0_75] : memref<28x112xf32, #tpu.memory_space<vmem>>, vector<2x112xf32>
    tpu.vector_store %arg20[%c24, %c0_75], %145 {strides = array<i32>} : memref<28x112xf32, #tpu.memory_space<vmem>>, vector<2x112xf32>,
    %147 = vector.extract_strided_slice %92 {offsets = [12, 0], sizes = [2, 112], strides = [1, 1]} : vector<14x112xf32> to vector<2x112xf32>
    %148 = arith.addf %95, %147 : vector<2x112xf32>
    %c26 = arith.constant 26 : index
    %c0_76 = arith.constant 0 : index
    %149 = vector.load %arg20[%c26, %c0_76] : memref<28x112xf32, #tpu.memory_space<vmem>>, vector<2x112xf32>
    tpu.vector_store %arg20[%c26, %c0_76], %148 {strides = array<i32>} : memref<28x112xf32, #tpu.memory_space<vmem>>, vector<2x112xf32>,
    %c0_77 = arith.constant 0 : index
    %c0_78 = arith.constant 0 : index
    %150 = vector.load %arg20[%c0_77, %c0_78] : memref<28x112xf32, #tpu.memory_space<vmem>>, vector<28x112xf32>
    %cst_79 = arith.constant dense<0.000000e+00> : vector<112xf32>
    %151 = vector.multi_reduction <add>, %150, %cst_79 [0] : vector<28x112xf32> to vector<112xf32>
    %152 = vector.shape_cast %151 : vector<112xf32> to vector<1x112xf32>
    %153 = arith.truncf %152 : vector<1x112xf32> to vector<1x112xbf16>
    %c0_80 = arith.constant 0 : index
    %c0_81 = arith.constant 0 : index
    %154 = vector.load %arg12[%c0_80, %c0_81] : memref<112x112xbf16, #tpu.memory_space<vmem>>, vector<112x112xbf16>
    %cst_82 = arith.constant dense<0.000000e+00> : vector<1x112xf32>
    %155 = tpu.matmul %153, %154, %cst_82 {dimension_numbers = #tpu.dot_dimension_numbers<[1], [0], [0], [1], [0, 0, 1, 1], [], []>} : vector<1x112xbf16>, vector<112x112xbf16>, vector<1x112xf32> -> vector<1x112xf32>
    %cst_83 = arith.constant 0.00255102036 : f32
    %156 = vector.broadcast %cst_83 : f32 to vector<1x112xf32>
    %157 = arith.mulf %155, %156 : vector<1x112xf32>
    %158 = vector.broadcast %157 : vector<1x112xf32> to vector<28x112xf32>
    %159 = arith.subf %150, %158 : vector<28x112xf32>
    %160 = arith.mulf %159, %159 : vector<28x112xf32>
    %cst_84 = arith.constant dense<0.000000e+00> : vector<112xf32>
    %161 = vector.multi_reduction <add>, %160, %cst_84 [0] : vector<28x112xf32> to vector<112xf32>
    %162 = vector.shape_cast %161 : vector<112xf32> to vector<1x112xf32>
    %163 = arith.truncf %162 : vector<1x112xf32> to vector<1x112xbf16>
    %c0_85 = arith.constant 0 : index
    %c0_86 = arith.constant 0 : index
    %164 = vector.load %arg12[%c0_85, %c0_86] : memref<112x112xbf16, #tpu.memory_space<vmem>>, vector<112x112xbf16>
    %cst_87 = arith.constant dense<0.000000e+00> : vector<1x112xf32>
    %165 = tpu.matmul %163, %164, %cst_87 {dimension_numbers = #tpu.dot_dimension_numbers<[1], [0], [0], [1], [0, 0, 1, 1], [], []>} : vector<1x112xbf16>, vector<112x112xbf16>, vector<1x112xf32> -> vector<1x112xf32>
    %cst_88 = arith.constant 0.00255102036 : f32
    %166 = vector.broadcast %cst_88 : f32 to vector<1x112xf32>
    %167 = arith.mulf %165, %166 : vector<1x112xf32>
    %cst_89 = arith.constant 9.99999974E-6 : f32
    %168 = vector.broadcast %cst_89 : f32 to vector<1x112xf32>
    %169 = arith.addf %167, %168 : vector<1x112xf32>
    %170 = math.rsqrt %169 : vector<1x112xf32>
    %c0_90 = arith.constant 0 : index
    %c0_91 = arith.constant 0 : index
    %171 = vector.load %arg13[%c0_90, %c0_91] : memref<1x112xf32, #tpu.memory_space<vmem>>, vector<1x112xf32>
    %172 = arith.mulf %170, %171 : vector<1x112xf32>
    %173 = vector.broadcast %172 : vector<1x112xf32> to vector<28x112xf32>
    %174 = arith.mulf %159, %173 : vector<28x112xf32>
    %c0_92 = arith.constant 0 : index
    %c0_93 = arith.constant 0 : index
    %175 = vector.load %arg14[%c0_92, %c0_93] : memref<1x112xf32, #tpu.memory_space<vmem>>, vector<1x112xf32>
    %176 = vector.broadcast %175 : vector<1x112xf32> to vector<28x112xf32>
    %177 = arith.addf %174, %176 : vector<28x112xf32>
    %cst_94 = arith.constant 0.000000e+00 : f32
    %178 = vector.broadcast %cst_94 : f32 to vector<28x112xf32>
    %179 = arith.maximumf %177, %178 : vector<28x112xf32>
    %180 = arith.truncf %179 : vector<28x112xf32> to vector<28x112xbf16>
    %c0_95 = arith.constant 0 : index
    %c0_96 = arith.constant 0 : index
    %181 = vector.load %arg15[%c0_95, %c0_96] : memref<112x384xbf16, #tpu.memory_space<vmem>>, vector<112x384xbf16>
    %cst_97 = arith.constant dense<0.000000e+00> : vector<28x384xf32>
    %182 = tpu.matmul %180, %181, %cst_97 {dimension_numbers = #tpu.dot_dimension_numbers<[1], [0], [0], [1], [0, 0, 1, 1], [], []>} : vector<28x112xbf16>, vector<112x384xbf16>, vector<28x384xf32> -> vector<28x384xf32>
    %183 = vector.extract_strided_slice %182 {offsets = [0, 0], sizes = [28, 28], strides = [1, 1]} : vector<28x384xf32> to vector<28x28xf32>
    %184 = vector.extract_strided_slice %182 {offsets = [0, 128], sizes = [28, 28], strides = [1, 1]} : vector<28x384xf32> to vector<28x28xf32>
    %185 = vector.extract_strided_slice %182 {offsets = [0, 256], sizes = [28, 28], strides = [1, 1]} : vector<28x384xf32> to vector<28x28xf32>
    %c0_98 = arith.constant 0 : index
    %c0_99 = arith.constant 0 : index
    %186 = vector.load %arg16[%c0_98, %c0_99] : memref<1x28xf32, #tpu.memory_space<vmem>>, vector<1x28xf32>
    %187 = vector.shape_cast %186 : vector<1x28xf32> to vector<1x28xf32>
    %188 = vector.broadcast %187 : vector<1x28xf32> to vector<2x28xf32>
    %189 = vector.extract_strided_slice %184 {offsets = [0, 0], sizes = [2, 28], strides = [1, 1]} : vector<28x28xf32> to vector<2x28xf32>
    %190 = arith.addf %188, %189 : vector<2x28xf32>
    %c0_100 = arith.constant 0 : index
    %c0_101 = arith.constant 0 : index
    %191 = vector.load %arg17[%c0_100, %c0_101] : memref<56x28xf32, #tpu.memory_space<vmem>>, vector<2x28xf32>
    tpu.vector_store %arg17[%c0_100, %c0_101], %190 {strides = array<i32>} : memref<56x28xf32, #tpu.memory_space<vmem>>, vector<2x28xf32>,
    %192 = vector.extract_strided_slice %183 {offsets = [2, 0], sizes = [2, 28], strides = [1, 1]} : vector<28x28xf32> to vector<2x28xf32>
    %193 = arith.addf %188, %192 : vector<2x28xf32>
    %194 = vector.extract_strided_slice %185 {offsets = [0, 0], sizes = [2, 28], strides = [1, 1]} : vector<28x28xf32> to vector<2x28xf32>
    %195 = arith.addf %193, %194 : vector<2x28xf32>
    %c2_102 = arith.constant 2 : index
    %c0_103 = arith.constant 0 : index
    %196 = vector.load %arg17[%c2_102, %c0_103] : memref<56x28xf32, #tpu.memory_space<vmem>>, vector<2x28xf32>
    tpu.vector_store %arg17[%c2_102, %c0_103], %195 {strides = array<i32>} : memref<56x28xf32, #tpu.memory_space<vmem>>, vector<2x28xf32>,
    %197 = vector.extract_strided_slice %184 {offsets = [2, 0], sizes = [2, 28], strides = [1, 1]} : vector<28x28xf32> to vector<2x28xf32>
    %198 = arith.addf %188, %197 : vector<2x28xf32>
    %c4_104 = arith.constant 4 : index
    %c0_105 = arith.constant 0 : index
    %199 = vector.load %arg17[%c4_104, %c0_105] : memref<56x28xf32, #tpu.memory_space<vmem>>, vector<2x28xf32>
    tpu.vector_store %arg17[%c4_104, %c0_105], %198 {strides = array<i32>} : memref<56x28xf32, #tpu.memory_space<vmem>>, vector<2x28xf32>,
    %200 = vector.extract_strided_slice %183 {offsets = [4, 0], sizes = [2, 28], strides = [1, 1]} : vector<28x28xf32> to vector<2x28xf32>
    %201 = arith.addf %188, %200 : vector<2x28xf32>
    %202 = vector.extract_strided_slice %185 {offsets = [2, 0], sizes = [2, 28], strides = [1, 1]} : vector<28x28xf32> to vector<2x28xf32>
    %203 = arith.addf %201, %202 : vector<2x28xf32>
    %c6_106 = arith.constant 6 : index
    %c0_107 = arith.constant 0 : index
    %204 = vector.load %arg17[%c6_106, %c0_107] : memref<56x28xf32, #tpu.memory_space<vmem>>, vector<2x28xf32>
    tpu.vector_store %arg17[%c6_106, %c0_107], %203 {strides = array<i32>} : memref<56x28xf32, #tpu.memory_space<vmem>>, vector<2x28xf32>,
    %205 = vector.extract_strided_slice %184 {offsets = [4, 0], sizes = [2, 28], strides = [1, 1]} : vector<28x28xf32> to vector<2x28xf32>
    %206 = arith.addf %188, %205 : vector<2x28xf32>
    %c8_108 = arith.constant 8 : index
    %c0_109 = arith.constant 0 : index
    %207 = vector.load %arg17[%c8_108, %c0_109] : memref<56x28xf32, #tpu.memory_space<vmem>>, vector<2x28xf32>
    tpu.vector_store %arg17[%c8_108, %c0_109], %206 {strides = array<i32>} : memref<56x28xf32, #tpu.memory_space<vmem>>, vector<2x28xf32>,
    %208 = vector.extract_strided_slice %183 {offsets = [6, 0], sizes = [2, 28], strides = [1, 1]} : vector<28x28xf32> to vector<2x28xf32>
    %209 = arith.addf %188, %208 : vector<2x28xf32>
    %210 = vector.extract_strided_slice %185 {offsets = [4, 0], sizes = [2, 28], strides = [1, 1]} : vector<28x28xf32> to vector<2x28xf32>
    %211 = arith.addf %209, %210 : vector<2x28xf32>
    %c10_110 = arith.constant 10 : index
    %c0_111 = arith.constant 0 : index
    %212 = vector.load %arg17[%c10_110, %c0_111] : memref<56x28xf32, #tpu.memory_space<vmem>>, vector<2x28xf32>
    tpu.vector_store %arg17[%c10_110, %c0_111], %211 {strides = array<i32>} : memref<56x28xf32, #tpu.memory_space<vmem>>, vector<2x28xf32>,
    %213 = vector.extract_strided_slice %184 {offsets = [6, 0], sizes = [2, 28], strides = [1, 1]} : vector<28x28xf32> to vector<2x28xf32>
    %214 = arith.addf %188, %213 : vector<2x28xf32>
    %c12_112 = arith.constant 12 : index
    %c0_113 = arith.constant 0 : index
    %215 = vector.load %arg17[%c12_112, %c0_113] : memref<56x28xf32, #tpu.memory_space<vmem>>, vector<2x28xf32>
    tpu.vector_store %arg17[%c12_112, %c0_113], %214 {strides = array<i32>} : memref<56x28xf32, #tpu.memory_space<vmem>>, vector<2x28xf32>,
    %216 = vector.extract_strided_slice %183 {offsets = [8, 0], sizes = [2, 28], strides = [1, 1]} : vector<28x28xf32> to vector<2x28xf32>
    %217 = arith.addf %188, %216 : vector<2x28xf32>
    %218 = vector.extract_strided_slice %185 {offsets = [6, 0], sizes = [2, 28], strides = [1, 1]} : vector<28x28xf32> to vector<2x28xf32>
    %219 = arith.addf %217, %218 : vector<2x28xf32>
    %c14_114 = arith.constant 14 : index
    %c0_115 = arith.constant 0 : index
    %220 = vector.load %arg17[%c14_114, %c0_115] : memref<56x28xf32, #tpu.memory_space<vmem>>, vector<2x28xf32>
    tpu.vector_store %arg17[%c14_114, %c0_115], %219 {strides = array<i32>} : memref<56x28xf32, #tpu.memory_space<vmem>>, vector<2x28xf32>,
    %221 = vector.extract_strided_slice %184 {offsets = [8, 0], sizes = [2, 28], strides = [1, 1]} : vector<28x28xf32> to vector<2x28xf32>
    %222 = arith.addf %188, %221 : vector<2x28xf32>
    %c16_116 = arith.constant 16 : index
    %c0_117 = arith.constant 0 : index
    %223 = vector.load %arg17[%c16_116, %c0_117] : memref<56x28xf32, #tpu.memory_space<vmem>>, vector<2x28xf32>
    tpu.vector_store %arg17[%c16_116, %c0_117], %222 {strides = array<i32>} : memref<56x28xf32, #tpu.memory_space<vmem>>, vector<2x28xf32>,
    %224 = vector.extract_strided_slice %183 {offsets = [10, 0], sizes = [2, 28], strides = [1, 1]} : vector<28x28xf32> to vector<2x28xf32>
    %225 = arith.addf %188, %224 : vector<2x28xf32>
    %226 = vector.extract_strided_slice %185 {offsets = [8, 0], sizes = [2, 28], strides = [1, 1]} : vector<28x28xf32> to vector<2x28xf32>
    %227 = arith.addf %225, %226 : vector<2x28xf32>
    %c18_118 = arith.constant 18 : index
    %c0_119 = arith.constant 0 : index
    %228 = vector.load %arg17[%c18_118, %c0_119] : memref<56x28xf32, #tpu.memory_space<vmem>>, vector<2x28xf32>
    tpu.vector_store %arg17[%c18_118, %c0_119], %227 {strides = array<i32>} : memref<56x28xf32, #tpu.memory_space<vmem>>, vector<2x28xf32>,
    %229 = vector.extract_strided_slice %184 {offsets = [10, 0], sizes = [2, 28], strides = [1, 1]} : vector<28x28xf32> to vector<2x28xf32>
    %230 = arith.addf %188, %229 : vector<2x28xf32>
    %c20_120 = arith.constant 20 : index
    %c0_121 = arith.constant 0 : index
    %231 = vector.load %arg17[%c20_120, %c0_121] : memref<56x28xf32, #tpu.memory_space<vmem>>, vector<2x28xf32>
    tpu.vector_store %arg17[%c20_120, %c0_121], %230 {strides = array<i32>} : memref<56x28xf32, #tpu.memory_space<vmem>>, vector<2x28xf32>,
    %232 = vector.extract_strided_slice %183 {offsets = [12, 0], sizes = [2, 28], strides = [1, 1]} : vector<28x28xf32> to vector<2x28xf32>
    %233 = arith.addf %188, %232 : vector<2x28xf32>
    %234 = vector.extract_strided_slice %185 {offsets = [10, 0], sizes = [2, 28], strides = [1, 1]} : vector<28x28xf32> to vector<2x28xf32>
    %235 = arith.addf %233, %234 : vector<2x28xf32>
    %c22_122 = arith.constant 22 : index
    %c0_123 = arith.constant 0 : index
    %236 = vector.load %arg17[%c22_122, %c0_123] : memref<56x28xf32, #tpu.memory_space<vmem>>, vector<2x28xf32>
    tpu.vector_store %arg17[%c22_122, %c0_123], %235 {strides = array<i32>} : memref<56x28xf32, #tpu.memory_space<vmem>>, vector<2x28xf32>,
    %237 = vector.extract_strided_slice %184 {offsets = [12, 0], sizes = [2, 28], strides = [1, 1]} : vector<28x28xf32> to vector<2x28xf32>
    %238 = arith.addf %188, %237 : vector<2x28xf32>
    %c24_124 = arith.constant 24 : index
    %c0_125 = arith.constant 0 : index
    %239 = vector.load %arg17[%c24_124, %c0_125] : memref<56x28xf32, #tpu.memory_space<vmem>>, vector<2x28xf32>
    tpu.vector_store %arg17[%c24_124, %c0_125], %238 {strides = array<i32>} : memref<56x28xf32, #tpu.memory_space<vmem>>, vector<2x28xf32>,
    %240 = vector.extract_strided_slice %183 {offsets = [14, 0], sizes = [2, 28], strides = [1, 1]} : vector<28x28xf32> to vector<2x28xf32>
    %241 = arith.addf %188, %240 : vector<2x28xf32>
    %242 = vector.extract_strided_slice %185 {offsets = [12, 0], sizes = [2, 28], strides = [1, 1]} : vector<28x28xf32> to vector<2x28xf32>
    %243 = arith.addf %241, %242 : vector<2x28xf32>
    %c26_126 = arith.constant 26 : index
    %c0_127 = arith.constant 0 : index
    %244 = vector.load %arg17[%c26_126, %c0_127] : memref<56x28xf32, #tpu.memory_space<vmem>>, vector<2x28xf32>
    tpu.vector_store %arg17[%c26_126, %c0_127], %243 {strides = array<i32>} : memref<56x28xf32, #tpu.memory_space<vmem>>, vector<2x28xf32>,
    %245 = vector.extract_strided_slice %184 {offsets = [14, 0], sizes = [2, 28], strides = [1, 1]} : vector<28x28xf32> to vector<2x28xf32>
    %246 = arith.addf %188, %245 : vector<2x28xf32>
    %c28 = arith.constant 28 : index
    %c0_128 = arith.constant 0 : index
    %247 = vector.load %arg17[%c28, %c0_128] : memref<56x28xf32, #tpu.memory_space<vmem>>, vector<2x28xf32>
    tpu.vector_store %arg17[%c28, %c0_128], %246 {strides = array<i32>} : memref<56x28xf32, #tpu.memory_space<vmem>>, vector<2x28xf32>,
    %248 = vector.extract_strided_slice %183 {offsets = [16, 0], sizes = [2, 28], strides = [1, 1]} : vector<28x28xf32> to vector<2x28xf32>
    %249 = arith.addf %188, %248 : vector<2x28xf32>
    %250 = vector.extract_strided_slice %185 {offsets = [14, 0], sizes = [2, 28], strides = [1, 1]} : vector<28x28xf32> to vector<2x28xf32>
    %251 = arith.addf %249, %250 : vector<2x28xf32>
    %c30 = arith.constant 30 : index
    %c0_129 = arith.constant 0 : index
    %252 = vector.load %arg17[%c30, %c0_129] : memref<56x28xf32, #tpu.memory_space<vmem>>, vector<2x28xf32>
    tpu.vector_store %arg17[%c30, %c0_129], %251 {strides = array<i32>} : memref<56x28xf32, #tpu.memory_space<vmem>>, vector<2x28xf32>,
    %253 = vector.extract_strided_slice %184 {offsets = [16, 0], sizes = [2, 28], strides = [1, 1]} : vector<28x28xf32> to vector<2x28xf32>
    %254 = arith.addf %188, %253 : vector<2x28xf32>
    %c32 = arith.constant 32 : index
    %c0_130 = arith.constant 0 : index
    %255 = vector.load %arg17[%c32, %c0_130] : memref<56x28xf32, #tpu.memory_space<vmem>>, vector<2x28xf32>
    tpu.vector_store %arg17[%c32, %c0_130], %254 {strides = array<i32>} : memref<56x28xf32, #tpu.memory_space<vmem>>, vector<2x28xf32>,
    %256 = vector.extract_strided_slice %183 {offsets = [18, 0], sizes = [2, 28], strides = [1, 1]} : vector<28x28xf32> to vector<2x28xf32>
    %257 = arith.addf %188, %256 : vector<2x28xf32>
    %258 = vector.extract_strided_slice %185 {offsets = [16, 0], sizes = [2, 28], strides = [1, 1]} : vector<28x28xf32> to vector<2x28xf32>
    %259 = arith.addf %257, %258 : vector<2x28xf32>
    %c34 = arith.constant 34 : index
    %c0_131 = arith.constant 0 : index
    %260 = vector.load %arg17[%c34, %c0_131] : memref<56x28xf32, #tpu.memory_space<vmem>>, vector<2x28xf32>
    tpu.vector_store %arg17[%c34, %c0_131], %259 {strides = array<i32>} : memref<56x28xf32, #tpu.memory_space<vmem>>, vector<2x28xf32>,
    %261 = vector.extract_strided_slice %184 {offsets = [18, 0], sizes = [2, 28], strides = [1, 1]} : vector<28x28xf32> to vector<2x28xf32>
    %262 = arith.addf %188, %261 : vector<2x28xf32>
    %c36 = arith.constant 36 : index
    %c0_132 = arith.constant 0 : index
    %263 = vector.load %arg17[%c36, %c0_132] : memref<56x28xf32, #tpu.memory_space<vmem>>, vector<2x28xf32>
    tpu.vector_store %arg17[%c36, %c0_132], %262 {strides = array<i32>} : memref<56x28xf32, #tpu.memory_space<vmem>>, vector<2x28xf32>,
    %264 = vector.extract_strided_slice %183 {offsets = [20, 0], sizes = [2, 28], strides = [1, 1]} : vector<28x28xf32> to vector<2x28xf32>
    %265 = arith.addf %188, %264 : vector<2x28xf32>
    %266 = vector.extract_strided_slice %185 {offsets = [18, 0], sizes = [2, 28], strides = [1, 1]} : vector<28x28xf32> to vector<2x28xf32>
    %267 = arith.addf %265, %266 : vector<2x28xf32>
    %c38 = arith.constant 38 : index
    %c0_133 = arith.constant 0 : index
    %268 = vector.load %arg17[%c38, %c0_133] : memref<56x28xf32, #tpu.memory_space<vmem>>, vector<2x28xf32>
    tpu.vector_store %arg17[%c38, %c0_133], %267 {strides = array<i32>} : memref<56x28xf32, #tpu.memory_space<vmem>>, vector<2x28xf32>,
    %269 = vector.extract_strided_slice %184 {offsets = [20, 0], sizes = [2, 28], strides = [1, 1]} : vector<28x28xf32> to vector<2x28xf32>
    %270 = arith.addf %188, %269 : vector<2x28xf32>
    %c40 = arith.constant 40 : index
    %c0_134 = arith.constant 0 : index
    %271 = vector.load %arg17[%c40, %c0_134] : memref<56x28xf32, #tpu.memory_space<vmem>>, vector<2x28xf32>
    tpu.vector_store %arg17[%c40, %c0_134], %270 {strides = array<i32>} : memref<56x28xf32, #tpu.memory_space<vmem>>, vector<2x28xf32>,
    %272 = vector.extract_strided_slice %183 {offsets = [22, 0], sizes = [2, 28], strides = [1, 1]} : vector<28x28xf32> to vector<2x28xf32>
    %273 = arith.addf %188, %272 : vector<2x28xf32>
    %274 = vector.extract_strided_slice %185 {offsets = [20, 0], sizes = [2, 28], strides = [1, 1]} : vector<28x28xf32> to vector<2x28xf32>
    %275 = arith.addf %273, %274 : vector<2x28xf32>
    %c42 = arith.constant 42 : index
    %c0_135 = arith.constant 0 : index
    %276 = vector.load %arg17[%c42, %c0_135] : memref<56x28xf32, #tpu.memory_space<vmem>>, vector<2x28xf32>
    tpu.vector_store %arg17[%c42, %c0_135], %275 {strides = array<i32>} : memref<56x28xf32, #tpu.memory_space<vmem>>, vector<2x28xf32>,
    %277 = vector.extract_strided_slice %184 {offsets = [22, 0], sizes = [2, 28], strides = [1, 1]} : vector<28x28xf32> to vector<2x28xf32>
    %278 = arith.addf %188, %277 : vector<2x28xf32>
    %c44 = arith.constant 44 : index
    %c0_136 = arith.constant 0 : index
    %279 = vector.load %arg17[%c44, %c0_136] : memref<56x28xf32, #tpu.memory_space<vmem>>, vector<2x28xf32>
    tpu.vector_store %arg17[%c44, %c0_136], %278 {strides = array<i32>} : memref<56x28xf32, #tpu.memory_space<vmem>>, vector<2x28xf32>,
    %280 = vector.extract_strided_slice %183 {offsets = [24, 0], sizes = [2, 28], strides = [1, 1]} : vector<28x28xf32> to vector<2x28xf32>
    %281 = arith.addf %188, %280 : vector<2x28xf32>
    %282 = vector.extract_strided_slice %185 {offsets = [22, 0], sizes = [2, 28], strides = [1, 1]} : vector<28x28xf32> to vector<2x28xf32>
    %283 = arith.addf %281, %282 : vector<2x28xf32>
    %c46 = arith.constant 46 : index
    %c0_137 = arith.constant 0 : index
    %284 = vector.load %arg17[%c46, %c0_137] : memref<56x28xf32, #tpu.memory_space<vmem>>, vector<2x28xf32>
    tpu.vector_store %arg17[%c46, %c0_137], %283 {strides = array<i32>} : memref<56x28xf32, #tpu.memory_space<vmem>>, vector<2x28xf32>,
    %285 = vector.extract_strided_slice %184 {offsets = [24, 0], sizes = [2, 28], strides = [1, 1]} : vector<28x28xf32> to vector<2x28xf32>
    %286 = arith.addf %188, %285 : vector<2x28xf32>
    %c48 = arith.constant 48 : index
    %c0_138 = arith.constant 0 : index
    %287 = vector.load %arg17[%c48, %c0_138] : memref<56x28xf32, #tpu.memory_space<vmem>>, vector<2x28xf32>
    tpu.vector_store %arg17[%c48, %c0_138], %286 {strides = array<i32>} : memref<56x28xf32, #tpu.memory_space<vmem>>, vector<2x28xf32>,
    %288 = vector.extract_strided_slice %183 {offsets = [26, 0], sizes = [2, 28], strides = [1, 1]} : vector<28x28xf32> to vector<2x28xf32>
    %289 = arith.addf %188, %288 : vector<2x28xf32>
    %290 = vector.extract_strided_slice %185 {offsets = [24, 0], sizes = [2, 28], strides = [1, 1]} : vector<28x28xf32> to vector<2x28xf32>
    %291 = arith.addf %289, %290 : vector<2x28xf32>
    %c50 = arith.constant 50 : index
    %c0_139 = arith.constant 0 : index
    %292 = vector.load %arg17[%c50, %c0_139] : memref<56x28xf32, #tpu.memory_space<vmem>>, vector<2x28xf32>
    tpu.vector_store %arg17[%c50, %c0_139], %291 {strides = array<i32>} : memref<56x28xf32, #tpu.memory_space<vmem>>, vector<2x28xf32>,
    %293 = vector.extract_strided_slice %184 {offsets = [26, 0], sizes = [2, 28], strides = [1, 1]} : vector<28x28xf32> to vector<2x28xf32>
    %294 = arith.addf %188, %293 : vector<2x28xf32>
    %c52 = arith.constant 52 : index
    %c0_140 = arith.constant 0 : index
    %295 = vector.load %arg17[%c52, %c0_140] : memref<56x28xf32, #tpu.memory_space<vmem>>, vector<2x28xf32>
    tpu.vector_store %arg17[%c52, %c0_140], %294 {strides = array<i32>} : memref<56x28xf32, #tpu.memory_space<vmem>>, vector<2x28xf32>,
    %296 = vector.extract_strided_slice %185 {offsets = [26, 0], sizes = [2, 28], strides = [1, 1]} : vector<28x28xf32> to vector<2x28xf32>
    %297 = arith.addf %188, %296 : vector<2x28xf32>
    %c54 = arith.constant 54 : index
    %c0_141 = arith.constant 0 : index
    %298 = vector.load %arg17[%c54, %c0_141] : memref<56x28xf32, #tpu.memory_space<vmem>>, vector<2x28xf32>
    tpu.vector_store %arg17[%c54, %c0_141], %297 {strides = array<i32>} : memref<56x28xf32, #tpu.memory_space<vmem>>, vector<2x28xf32>,
    %c0_142 = arith.constant 0 : index
    %c0_143 = arith.constant 0 : index
    %299 = vector.load %arg17[%c0_142, %c0_143] : memref<56x28xf32, #tpu.memory_space<vmem>>, vector<56x28xf32>
    %cst_144 = arith.constant 0.000000e+00 : f32
    %300 = vector.broadcast %cst_144 : f32 to vector<56x28xf32>
    %301 = arith.subf %300, %299 : vector<56x28xf32>
    %302 = math.exp %301 : vector<56x28xf32>
    %cst_145 = arith.constant 1.000000e+00 : f32
    %303 = vector.broadcast %cst_145 : f32 to vector<56x28xf32>
    %304 = arith.addf %303, %302 : vector<56x28xf32>
    %cst_146 = arith.constant 1.000000e+00 : f32
    %305 = vector.broadcast %cst_146 : f32 to vector<56x28xf32>
    %306 = arith.divf %305, %304 : vector<56x28xf32>
    %c0_147 = arith.constant 0 : index
    %c0_148 = arith.constant 0 : index
    %307 = vector.load %arg17[%c0_147, %c0_148] : memref<56x28xf32, #tpu.memory_space<vmem>>, vector<56x28xf32>
    tpu.vector_store %arg17[%c0_147, %c0_148], %306 {strides = array<i32>} : memref<56x28xf32, #tpu.memory_space<vmem>>, vector<56x28xf32>,
    return
  }
}

</mosaic_0001>

<bundles_post_ra>
// kernel: decoder_forward.1
= control target key start
LH: loop header
LB: loop body
LE: loop exit
PB: predicated region body
PF: predicated region fallthrough
CT: control target
= control target key end

     0   :  { %s2908_s0 = inlined_call_operand.vmem [shape: bf16[2,8], index: 0, kind: input, shape index: {}]   ;;  %s2909_s1 = inlined_call_operand.vmem [shape: bf16[8,128], index: 1, kind: input, shape index: {}]   ;;  %s2910_s2 = inlined_call_operand.hbm [shape: f32[1,128], index: 2, kind: input, shape index: {}]   ;;  %s2911_s3 = inlined_call_operand.hbm [shape: bf16[128,384], index: 3, kind: input, shape index: {}]   ;;  %s2912_s4 = inlined_call_operand.vmem [shape: f32[1,384], index: 4, kind: input, shape index: {}]   ;;  %s2913_s5 = inlined_call_operand.hbm [shape: bf16[96,384], index: 5, kind: input, shape index: {}]   ;;  %s2914_s6 = inlined_call_operand.hbm [shape: f32[1,112], index: 6, kind: input, shape index: {}]   ;;  %s2915_s7 = inlined_call_operand.hbm [shape: bf16[112,112], index: 7, kind: input, shape index: {}]   ;;  %s2916_s8 = inlined_call_operand.vmem [shape: f32[1,112], index: 8, kind: input, shape index: {}]   ;;  %s2917_s9 = inlined_call_operand.hbm [shape: f32[1,112], index: 9, kind: input, shape index: {}]   ;;  %s2918_s10 = inlined_call_operand.hbm [shape: bf16[112,384], index: 10, kind: input, shape index: {}]   ;;  %s2919_s11 = inlined_call_operand.hbm [shape: f32[1,112], index: 11, kind: input, shape index: {}]   ;;  %s2920_s12 = inlined_call_operand.hbm [shape: bf16[112,112], index: 12, kind: input, shape index: {}]   ;;  %s2921_s13 = inlined_call_operand.vmem [shape: f32[1,112], index: 13, kind: input, shape index: {}]   ;;  %s2922_s14 = inlined_call_operand.hbm [shape: f32[1,112], index: 14, kind: input, shape index: {}]   ;;  %s2923_s15 = inlined_call_operand.hbm [shape: bf16[112,384], index: 15, kind: input, shape index: {}]   ;;  %s2924_s16 = inlined_call_operand.hbm [shape: f32[1,28], index: 16, kind: input, shape index: {}]   ;;  %s2925_s17 = inlined_call_operand.vmem [shape: f32[56,28], index: 17, kind: output, shape index: {}]  }
   0x1   :  { %2926 = sst [smem:[#allocation31_spill]] %s2908_s0 }
   0x2   :  { %2927 = sst [smem:[#allocation32_spill]] %s2909_s1 }
   0x3   :  { %22 = vsyncpa [#allocation6], 0 }
   0x4   :  { %23 = vsyncpa [#allocation8], 0 }
   0x5   :  { %24 = vsyncpa [#allocation11], 0 }
   0x6   :  { %25 = vsyncpa [#allocation14], 0 }
   0x7   :  { %26 = vsyncpa [#allocation17], 0 }
   0x8   :  { %27 = vsyncpa [#allocation20], 0  ;;  %s48_s26 = sshll.u32 %s2911_s3, 4  ;;  %s49_s26 = int_to_ptr.hbm [resolvable:$true] %s48_s26 }
   0x9   :  { %28 = vsyncpa [#allocation23], 0  ;;  %s2476_s27 = smov [#allocation7]   ;;  %s77_s30 = sshll.u32 %s2914_s6, 4  ;;  %s78_s30 = int_to_ptr.hbm [resolvable:$true] %s77_s30 }
   0xa   :  { %s50_s28 = sshll.u32 %s2476_s27, 4  ;;  %s2477_s18 = smov 192   ;;  %s51_s28 = int_to_ptr.vmem [resolvable:$true] %s50_s28 }
   0xb   :  { %s2478_s19 = smov 12   ;;  %s2479_s1 = smov [#allocation10]  }
   0xc   :  { %56 = dma.hbm_to_vmem [thread:$0]  %s49_s26, 3072, %s51_s28, [#allocation8], %s2477_s18, %s2477_s18, %s2478_s19  }
   0xd   :  { %s79_s20 = sshll.u32 %s2479_s1, 4  ;;  %s103_s22 = sshll.u32 %s2917_s9, 4  ;;  %s80_s20 = int_to_ptr.vmem [resolvable:$true] %s79_s20  ;;  %s104_s22 = int_to_ptr.hbm [resolvable:$true] %s103_s22 }
   0xe   :  { %82 = dma.hbm_to_vmem [thread:$0]  %s78_s30, 16, %s80_s20, [#allocation11]  }
   0xf   :  { %s127_s6 = sshll.u32 %s2919_s11, 4  ;;  %s2480_s25 = smov [#allocation13]   ;;  %s128_s6 = int_to_ptr.hbm [resolvable:$true] %s127_s6 }
  0x10   :  { %s105_s27 = sshll.u32 %s2480_s25, 4  ;;  %s2481_s26 = smov [#allocation16]   ;;  %s106_s27 = int_to_ptr.vmem [resolvable:$true] %s105_s27 }
  0x11   :  { %108 = dma.hbm_to_vmem [thread:$0]  %s104_s22, 16, %s106_s27, [#allocation14]  }
  0x12   :  { %s129_s28 = sshll.u32 %s2481_s26, 4  ;;  %s153_s1 = sshll.u32 %s2922_s14, 4  ;;  %s130_s28 = int_to_ptr.vmem [resolvable:$true] %s129_s28  ;;  %s154_s1 = int_to_ptr.hbm [resolvable:$true] %s153_s1 }
  0x13   :  { %132 = dma.hbm_to_vmem [thread:$0]  %s128_s6, 16, %s130_s28, [#allocation17]  }
  0x14   :  { %s38_s20 = sshll.u32 %s2910_s2, 4  ;;  %s2482_s21 = smov [#allocation19]   ;;  %s39_s20 = int_to_ptr.hbm [resolvable:$true] %s38_s20 }
  0x15   :  { %s155_s11 = sshll.u32 %s2482_s21, 4  ;;  %s2483_s3 = smov [#allocation5]   ;;  %s156_s11 = int_to_ptr.vmem [resolvable:$true] %s155_s11 }
  0x16   :  { %158 = dma.hbm_to_vmem [thread:$0]  %s154_s1, 16, %s156_s11, [#allocation20]  }
  0x17   :  { %s40_s22 = sshll.u32 %s2483_s3, 4  ;;  %s63_s25 = sshll.u32 %s2913_s5, 4  ;;  %s41_s22 = int_to_ptr.vmem [resolvable:$true] %s40_s22  ;;  %s64_s25 = int_to_ptr.hbm [resolvable:$true] %s63_s25 }
  0x18   :  { %43 = dma.hbm_to_vmem [thread:$0]  %s39_s20, 16, %s41_s22, [#allocation6]  }
  0x19   :  { %s87_s27 = sshll.u32 %s2915_s7, 4  ;;  %s2484_s26 = smov [#allocation9]   ;;  %s88_s27 = int_to_ptr.hbm [resolvable:$true] %s87_s27 }
  0x1a   :  { %s65_s2 = sshll.u32 %s2484_s26, 4  ;;  %s2485_s28 = smov [#allocation12]   ;;  %s66_s2 = int_to_ptr.vmem [resolvable:$true] %s65_s2 }
  0x1b   :  { %71 = dma.hbm_to_vmem [thread:$0]  %s64_s25, 2304, %s66_s2, [#allocation8], %s2477_s18, %s2477_s18, %s2478_s19  }
  0x1c   :  { %s89_s29 = sshll.u32 %s2485_s28, 4  ;;  %s2486_s0 = smov 64   ;;  %s90_s29 = int_to_ptr.vmem [resolvable:$true] %s89_s29 }
  0x1d   :  { %s2487_s5 = smov 4   ;;  %s113_s30 = sshll.u32 %s2918_s10, 4  ;;  %s114_s30 = int_to_ptr.hbm [resolvable:$true] %s113_s30 }
  0x1e   :  { %95 = dma.hbm_to_vmem [thread:$0]  %s88_s27, 896, %s90_s29, [#allocation11], %s2486_s0, %s2486_s0, %s2487_s5  }
  0x1f   :  { %s2488_s7 = smov [#allocation15]   ;;  %s137_s3 = sshll.u32 %s2920_s12, 4  ;;  %s138_s3 = int_to_ptr.hbm [resolvable:$true] %s137_s3 }
  0x20   :  { %s115_s20 = sshll.u32 %s2488_s7, 4  ;;  %s2489_s22 = smov [#allocation18]   ;;  %s116_s20 = int_to_ptr.vmem [resolvable:$true] %s115_s20 }
  0x21   :  { %121 = dma.hbm_to_vmem [thread:$0]  %s114_s30, 2688, %s116_s20, [#allocation14], %s2477_s18, %s2477_s18, %s2478_s19  }
  0x22   :  { %s139_s23 = sshll.u32 %s2489_s22, 4  ;;  %s163_s14 = sshll.u32 %s2923_s15, 4  ;;  %s140_s23 = int_to_ptr.vmem [resolvable:$true] %s139_s23  ;;  %s164_s14 = int_to_ptr.hbm [resolvable:$true] %s163_s14 }
  0x23   :  { %145 = dma.hbm_to_vmem [thread:$0]  %s138_s3, 896, %s140_s23, [#allocation17], %s2486_s0, %s2486_s0, %s2487_s5  }
  0x24   :  { %s177_s27 = sshll.u32 %s2924_s16, 4  ;;  %s2490_s26 = smov [#allocation21]   ;;  %s178_s27 = int_to_ptr.hbm [resolvable:$true] %s177_s27 }
  0x25   :  { %s165_s12 = sshll.u32 %s2490_s26, 4  ;;  %s2491_s2 = smov [#allocation22]   ;;  %s166_s12 = int_to_ptr.vmem [resolvable:$true] %s165_s12 }
  0x26   :  { %171 = dma.hbm_to_vmem [thread:$0]  %s164_s14, 2688, %s166_s12, [#allocation20], %s2477_s18, %s2477_s18, %s2478_s19  }
  0x27   :  { %s179_s28 = sshll.u32 %s2491_s2, 4  ;;  %s180_s28 = int_to_ptr.vmem [resolvable:$true] %s179_s28 }
  0x28   :  { %182 = dma.hbm_to_vmem [thread:$0]  %s178_s27, 16, %s180_s28, [#allocation23]  }
  0x29   :  { %2462 = dma.done.wait [#allocation6], 16  }
  0x2a   :  { %2463 = vsyncadd [#allocation6], 4294967280 }
  0x2b   :  { %2464 = dma.done.wait [#allocation8], 5376  }
  0x2c   :  { %2465 = vsyncadd [#allocation8], 4294961920 }
  0x2d   :  { %2466 = dma.done.wait [#allocation11], 912  }
  0x2e   :  { %2467 = vsyncadd [#allocation11], 4294966384 }
  0x2f   :  { %2468 = dma.done.wait [#allocation14], 2704  }
  0x30   :  { %2469 = vsyncadd [#allocation14], 4294964592 }
  0x31   :  { %2470 = dma.done.wait [#allocation17], 912  }
  0x32   :  { %2471 = vsyncadd [#allocation17], 4294966384 }
  0x33   :  { %2472 = dma.done.wait [#allocation20], 2704  }
  0x34   :  { %2473 = vsyncadd [#allocation20], 4294964592 }
  0x35   :  { %2474 = dma.done.wait [#allocation23], 16  }
  0x36   :  { %2475 = vsyncadd [#allocation23], 4294967280  ;;  %vm242_vm0 = vcmask 1043456   ;;  %s2928_s18 = sld [smem:[#allocation32_spill]]  ;;  %v1700_v2 = vld [vmem:[#allocation7 + $0xa8] sm:$0xf] }
  0x37   :  { %s2929_s0 = sld [smem:[#allocation31_spill]]  ;;  %vm238_vm1 = vcmask 64512   ;;  %v2044_v4 = vld [vmem:[#allocation7 + $0xb0] sm:$0xf0]  ;;  %v2043_v5 = vld [vmem:[#allocation7 + $0xac] sm:$0xf] }
  0x38   :  { %v1701_v6 = vor.u32 %v2044_v4, %v1700_v2  ;;  %v1702_v7 = vld [vmem:[#allocation7 + $0xb4] sm:$0xf0]  ;;  %v1708_v8 = vld [vmem:[#allocation7 + $0xb0] sm:$0xf]  ;;  %v2045_v9 = vld [vmem:[#allocation7 + $0xb8] sm:$0xf0] }
  0x39   :  { %v1705_v10 = vor.u32 %v2043_v5, %v1702_v7  ;;  %v1709_v11 = vor.u32 %v2045_v9, %v1708_v8  ;;  %v1688_v12 = vld [vmem:[#allocation7 + $0x90] sm:$0xf]  ;;  %v2041_v13 = vld [vmem:[#allocation7 + $0x98] sm:$0xf0]  ;;  %v2040_v14 = vld [vmem:[#allocation7 + $0x94] sm:$0xf] }
  0x3a   :  { %429 = vmatpush.bf16.msra.mxu1 %v1701_v6  ;;  %v1689_v15 = vor.u32 %v2041_v13, %v1688_v12  ;;  %v1690_v16 = vld [vmem:[#allocation7 + $0x9c] sm:$0xf0]  ;;  %v1696_v17 = vld [vmem:[#allocation7 + $0x98] sm:$0xf]  ;;  %v2042_v18 = vld [vmem:[#allocation7 + $0xa0] sm:$0xf0] }
  0x3b   :  { %442 = vmatpush.bf16.msra.mxu2 %v1705_v10  ;;  %v1693_v19 = vor.u32 %v2040_v14, %v1690_v16  ;;  %v1676_v20 = vld [vmem:[#allocation7 + $0x78] sm:$0xf]  ;;  %v2038_v21 = vld [vmem:[#allocation7 + $0x80] sm:$0xf0]  ;;  %455 = vmatpush.bf16.msra.mxu3 %v1709_v11  ;;  %v1697_v22 = vor.u32 %v2042_v18, %v1696_v17  ;;  %v2037_v23 = vld [vmem:[#allocation7 + $0x7c] sm:$0xf] }
  0x3c   :  { %v233_v0 = vld [vmem:[%s2928_s18] sm:$0xf]  ;;  %v1684_v25 = vld [vmem:[#allocation7 + $0x80] sm:$0xf]  ;;  %v2039_v26 = vld [vmem:[#allocation7 + $0x88] sm:$0xf0]  ;;  %v1677_v27 = vor.u32 %v2038_v21, %v1676_v20 }
  0x3d   :  { %v232_v1 = vld [vmem:[%s2929_s0] sm:$0x1]  ;;  %v244_v3 = vsel %vm242_vm0, %v233_v0, 0  ;;  %v1678_v24 = vld [vmem:[#allocation7 + $0x84] sm:$0xf0]  ;;  %v1685_v31 = vor.u32 %v2039_v26, %v1684_v25  ;;  %vm471_vm2 = vcmask 779264  }
  0x3e   :  { %253 = vmatpush.bf16.msra.mxu0 %v244_v3  ;;  %430 = vmatpush.bf16.msra.mxu1 %v1689_v15  ;;  %v1681_v28 = vor.u32 %v2037_v23, %v1678_v24  ;;  %v1664_v29 = vld [vmem:[#allocation7 + $0x60] sm:$0xf]  ;;  %v2035_v30 = vld [vmem:[#allocation7 + $0x68] sm:$0xf0]  ;;  %v2034_v32 = vld [vmem:[#allocation7 + $0x64] sm:$0xf] }
  0x3f   :  { %443 = vmatpush.bf16.msra.mxu2 %v1693_v19  ;;  %456 = vmatpush.bf16.msra.mxu3 %v1697_v22  ;;  %v1666_v33 = vld [vmem:[#allocation7 + $0x6c] sm:$0xf0]  ;;  %v1672_v34 = vld [vmem:[#allocation7 + $0x68] sm:$0xf]  ;;  %v2036_v35 = vld [vmem:[#allocation7 + $0x70] sm:$0xf0]  ;;  %v1665_v36 = vor.u32 %v2035_v30, %v1664_v29 }
  0x40   :  { %v1652_v37 = vld [vmem:[#allocation7 + $0x48] sm:$0xf]  ;;  %v2032_v38 = vld [vmem:[#allocation7 + $0x50] sm:$0xf0]  ;;  %v2031_v39 = vld [vmem:[#allocation7 + $0x4c] sm:$0xf]  ;;  %v1669_v40 = vor.u32 %v2034_v32, %v1666_v33  ;;  %v1673_v42 = vor.u32 %v2036_v35, %v1672_v34 }
  0x41   :  { %1613 = vmatmul.msk.bf16.vlgmr.msra.gmra.mxu0 %vm238_vm1, %v232_v1  ;;  %v1654_v41 = vld [vmem:[#allocation7 + $0x54] sm:$0xf0]  ;;  %v1660_v43 = vld [vmem:[#allocation7 + $0x50] sm:$0xf]  ;;  %v2033_v44 = vld [vmem:[#allocation7 + $0x58] sm:$0xf0]  ;;  %v1653_v45 = vor.u32 %v2032_v38, %v1652_v37 }
  0x42   :  { %431 = vmatpush.bf16.msra.mxu1 %v1677_v27  ;;  %v1657_v46 = vor.u32 %v2031_v39, %v1654_v41  ;;  %v1640_v47 = vld [vmem:[#allocation7 + $0x30] sm:$0xf]  ;;  %v2029_v48 = vld [vmem:[#allocation7 + $0x38] sm:$0xf0]  ;;  %v1661_v49 = vor.u32 %v2033_v44, %v1660_v43  ;;  %v2028_v50 = vld [vmem:[#allocation7 + $0x34] sm:$0xf] }
  0x43   :  { %444 = vmatpush.bf16.msra.mxu2 %v1681_v28  ;;  %457 = vmatpush.bf16.msra.mxu3 %v1685_v31  ;;  %v1642_v51 = vld [vmem:[#allocation7 + $0x3c] sm:$0xf0]  ;;  %v1648_v52 = vld [vmem:[#allocation7 + $0x38] sm:$0xf]  ;;  %v2030_v53 = vld [vmem:[#allocation7 + $0x40] sm:$0xf0]  ;;  %v1641_v54 = vor.u32 %v2029_v48, %v1640_v47 }
  0x44   :  { %v1645_v55 = vor.u32 %v2028_v50, %v1642_v51  ;;  %v1649_v56 = vor.u32 %v2030_v53, %v1648_v52  ;;  %v1628_v57 = vld [vmem:[#allocation7 + $0x18] sm:$0xf]  ;;  %v2026_v58 = vld [vmem:[#allocation7 + $0x20] sm:$0xf0]  ;;  %v2025_v59 = vld [vmem:[#allocation7 + $0x1c] sm:$0xf] }
  0x45   :  { %v1629_v60 = vor.u32 %v2026_v58, %v1628_v57  ;;  %v1630_v61 = vld [vmem:[#allocation7 + $0x24] sm:$0xf0]  ;;  %v1636_v62 = vld [vmem:[#allocation7 + $0x20] sm:$0xf]  ;;  %v2027_v63 = vld [vmem:[#allocation7 + $0x28] sm:$0xf0] }
  0x46   :  { %432 = vmatpush.bf16.msra.mxu1 %v1665_v36  ;;  %v1633_v0 = vor.u32 %v2025_v59, %v1630_v61  ;;  %v1637_v1 = vor.u32 %v2027_v63, %v1636_v62  ;;  %v1616_v2 = vld [vmem:[#allocation7] sm:$0xf]  ;;  %v2023_v3 = vld [vmem:[#allocation7 + $0x8] sm:$0xf0]  ;;  %v2022_v4 = vld [vmem:[#allocation7 + $0x4] sm:$0xf] }
  0x47   :  { %445 = vmatpush.bf16.msra.mxu2 %v1669_v40  ;;  %458 = vmatpush.bf16.msra.mxu3 %v1673_v42  ;;  %v1617_v5 = vor.u32 %v2023_v3, %v1616_v2  ;;  %v1618_v6 = vld [vmem:[#allocation7 + $0xc] sm:$0xf0]  ;;  %v1624_v7 = vld [vmem:[#allocation7 + $0x8] sm:$0xf]  ;;  %v2024_v8 = vld [vmem:[#allocation7 + $0x10] sm:$0xf0] }
  0x48   :  { %v1621_v9 = vor.u32 %v2022_v4, %v1618_v6  ;;  %v1625_v10 = vor.u32 %v2024_v8, %v1624_v7  ;;  %v1772_v11 = vld [vmem:[#allocation9 + $0x78] sm:$0xf]  ;;  %v2062_v12 = vld [vmem:[#allocation9 + $0x80] sm:$0xf0]  ;;  %v1760_v13 = vld [vmem:[#allocation9 + $0x60] sm:$0xf] }
  0x49   :  { %v1773_v14 = vor.u32 %v2062_v12, %v1772_v11  ;;  %v2059_v15 = vld [vmem:[#allocation9 + $0x68] sm:$0xf0]  ;;  %v1780_v16 = vld [vmem:[#allocation9 + $0x80] sm:$0xf]  ;;  %v2136_v20 = vld [vmem:[#allocation5] ss:$0 sm:$0xff] }
  0x4a   :  { %433 = vmatpush.bf16.msra.mxu1 %v1653_v45  ;;  %v2063_v17 = vld [vmem:[#allocation9 + $0x88] sm:$0xf0]  ;;  %v1761_v19 = vor.u32 %v2059_v15, %v1760_v13  ;;  %v1748_v26 = vld [vmem:[#allocation9 + $0x48] sm:$0xf]  ;;  %v2056_v27 = vld [vmem:[#allocation9 + $0x50] sm:$0xf0] }
  0x4b   :  { %446 = vmatpush.bf16.msra.mxu2 %v1657_v46  ;;  %459 = vmatpush.bf16.msra.mxu3 %v1661_v49  ;;  %v1781_v18 = vor.u32 %v2063_v17, %v1780_v16  ;;  %v1749_v28 = vor.u32 %v2056_v27, %v1748_v26  ;;  %v1768_v29 = vld [vmem:[#allocation9 + $0x68] sm:$0xf]  ;;  %v2060_v30 = vld [vmem:[#allocation9 + $0x70] sm:$0xf0]  ;;  %v1736_v32 = vld [vmem:[#allocation9 + $0x30] sm:$0xf] }
  0x4c   :  { %603 = vmatpush.bf16.msrb.mxu0 %v1773_v14  ;;  %v1769_v31 = vor.u32 %v2060_v30, %v1768_v29  ;;  %v2053_v33 = vld [vmem:[#allocation9 + $0x38] sm:$0xf0]  ;;  %v1756_v35 = vld [vmem:[#allocation9 + $0x50] sm:$0xf]  ;;  %v1724_v38 = vld [vmem:[#allocation9 + $0x18] sm:$0xf] }
  0x4d   :  { %v1737_v34 = vor.u32 %v2053_v33, %v1736_v32  ;;  %v2057_v36 = vld [vmem:[#allocation9 + $0x58] sm:$0xf0]  ;;  %v2050_v39 = vld [vmem:[#allocation9 + $0x20] sm:$0xf0]  ;;  %v1744_v41 = vld [vmem:[#allocation9 + $0x38] sm:$0xf] }
  0x4e   :  { %434 = vmatpush.bf16.msra.mxu1 %v1641_v54  ;;  %v1757_v37 = vor.u32 %v2057_v36, %v1756_v35  ;;  %v1725_v40 = vor.u32 %v2050_v39, %v1724_v38  ;;  %v2054_v42 = vld [vmem:[#allocation9 + $0x40] sm:$0xf0]  ;;  %v1712_v44 = vld [vmem:[#allocation9] sm:$0xf]  ;;  %v2047_v45 = vld [vmem:[#allocation9 + $0x8] sm:$0xf0] }
  0x4f   :  { %447 = vmatpush.bf16.msra.mxu2 %v1645_v55  ;;  %460 = vmatpush.bf16.msra.mxu3 %v1649_v56  ;;  %v1745_v43 = vor.u32 %v2054_v42, %v1744_v41  ;;  %v1713_v46 = vor.u32 %v2047_v45, %v1712_v44  ;;  %v2061_v47 = vld [vmem:[#allocation9 + $0x7c] sm:$0xf]  ;;  %v1774_v48 = vld [vmem:[#allocation9 + $0x84] sm:$0xf0]  ;;  %v1732_v49 = vld [vmem:[#allocation9 + $0x20] sm:$0xf] }
  0x50   :  { %604 = vmatpush.bf16.msrb.mxu0 %v1761_v19  ;;  %v1777_v50 = vor.u32 %v2061_v47, %v1774_v48  ;;  %v2051_v51 = vld [vmem:[#allocation9 + $0x28] sm:$0xf0]  ;;  %v2058_v53 = vld [vmem:[#allocation9 + $0x64] sm:$0xf]  ;;  %v1762_v54 = vld [vmem:[#allocation9 + $0x6c] sm:$0xf0] }
  0x51   :  { %v1733_v52 = vor.u32 %v2051_v51, %v1732_v49  ;;  %v1720_v55 = vld [vmem:[#allocation9 + $0x8] sm:$0xf]  ;;  %v1765_v56 = vor.u32 %v2058_v53, %v1762_v54  ;;  %v2048_v57 = vld [vmem:[#allocation9 + $0x10] sm:$0xf0]  ;;  %v2055_v59 = vld [vmem:[#allocation9 + $0x4c] sm:$0xf] }
  0x52   :  { %435 = vmatpush.bf16.msra.mxu1 %v1629_v60  ;;  %v1721_v58 = vor.u32 %v2048_v57, %v1720_v55  ;;  %v1750_v60 = vld [vmem:[#allocation9 + $0x54] sm:$0xf0]  ;;  %v2052_v62 = vld [vmem:[#allocation9 + $0x34] sm:$0xf]  ;;  %v1738_v63 = vld [vmem:[#allocation9 + $0x3c] sm:$0xf0] }
  0x53   :  { %448 = vmatpush.bf16.msra.mxu2 %v1633_v0  ;;  %461 = vmatpush.bf16.msra.mxu3 %v1637_v1  ;;  %v1753_v61 = vor.u32 %v2055_v59, %v1750_v60  ;;  %v1741_v0 = vor.u32 %v2052_v62, %v1738_v63  ;;  %v2049_v1 = vld [vmem:[#allocation9 + $0x1c] sm:$0xf]  ;;  %v1726_v2 = vld [vmem:[#allocation9 + $0x24] sm:$0xf0]  ;;  %v1714_v6 = vld [vmem:[#allocation9 + $0xc] sm:$0xf0] }
  0x54   :  { %605 = vmatpush.bf16.msrb.mxu0 %v1749_v28  ;;  %v293_v3 = vld [vmem:[%s2912_s4] sm:$0x7]  ;;  %v1729_v4 = vor.u32 %v2049_v1, %v1726_v2  ;;  %vm597_vm3 = vcmask 785408   ;;  %v2069_v26 = vld [vmem:[#allocation12 + $0x28] sm:$0xff]  ;;  %v2068_v27 = vld [vmem:[#allocation12 + $0x20] sm:$0xff]  ;;  %vm645_vm4 = vcmask 910336  }
  0x55   :  { %v295_v7 = vperm.slane %v293_v3, 0  ;;  %v296_v12 = vperm.slane %v293_v3, 1  ;;  %v297_v13 = vperm.slane %v293_v3, 2  ;;  %v2067_v28 = vld [vmem:[#allocation12 + $0x18] sm:$0xff]  ;;  %v2066_v30 = vld [vmem:[#allocation12 + $0x10] sm:$0xff]  ;;  %vm656_vm5 = vcmask 914436  }
  0x56   :  { %436 = vmatpush.bf16.msra.mxu1 %v1617_v5  ;;  %v2046_v5 = vld [vmem:[#allocation9 + $0x4] sm:$0xf]  ;;  %v2137_v29 = vld [vmem:[#allocation10] ss:$0 sm:$0xff]  ;;  %vm653_vm6 = vcmask 912386   ;;  %v2064_v38 = vld [vmem:[#allocation12] sm:$0xff] }
  0x57   :  { %449 = vmatpush.bf16.msra.mxu2 %v1621_v9  ;;  %462 = vmatpush.bf16.msra.mxu3 %v1625_v10  ;;  %v1717_v8 = vor.u32 %v2046_v5, %v1714_v6  ;;  %vm663_vm7 = vcmask 916480   ;;  %vm665_vm8 = vcmask 914432   ;;  %vm1005_vm12 = vcmask 916486  }
  0x58   :  { %606 = vmatpush.bf16.msrb.mxu0 %v1737_v34  ;;  %vm1032_vm13 = vcmask 912384   ;;  %vm1395_vm1 = vcmask 222208  }
  0x5a   :  { %629 = vmatpush.bf16.msrb.mxu1 %v1781_v18 }
  0x5c   :  { %607 = vmatpush.bf16.msrb.mxu0 %v1725_v40 }
  0x5e   :  { %630 = vmatpush.bf16.msrb.mxu1 %v1769_v31 }
  0x60   :  { %608 = vmatpush.bf16.msrb.mxu0 %v1713_v46 }
  0x62   :  { %631 = vmatpush.bf16.msrb.mxu1 %v1757_v37  ;;  %v2065_v37 = vld [vmem:[#allocation12 + $0x8] sm:$0xff] }
  0x64   :  { %616 = vmatpush.bf16.msra.mxu0 %v1777_v50 }
  0x66   :  { %632 = vmatpush.bf16.msrb.mxu1 %v1745_v43 }
  0x68   :  { %617 = vmatpush.bf16.msra.mxu0 %v1765_v56 }
  0x6a   :  { %633 = vmatpush.bf16.msrb.mxu1 %v1733_v52 }
  0x6c   :  { %618 = vmatpush.bf16.msra.mxu0 %v1753_v61 }
  0x6e   :  { %634 = vmatpush.bf16.msrb.mxu1 %v1721_v58 }
  0x70   :  { %619 = vmatpush.bf16.msra.mxu0 %v1741_v0 }
  0x74   :  { %620 = vmatpush.bf16.msra.mxu0 %v1729_v4 }
  0x78   :  { %621 = vmatpush.bf16.msra.mxu0 %v1717_v8 }
  0xbe   :  { %v255_v21 = vpop.f32.mrf.mxu0 }
  0xbf   :  { %v256_v22 = vadd.f32 %v2136_v20, %v255_v21 }
  0xc1   :  { %v259_v23 = vmax.f32 %v256_v22, 0.0 }
  0xc3   :  { %v260_v24 = vpack.c.bf16 %v259_v23, %v259_v23 }
  0xc5   :  { %437 = vmatmul.bf16.vlgmr.msra.gmra.mxu1 %v260_v24  ;;  %450 = vmatmul.bf16.vlgmr.msra.gmra.mxu2 %v260_v24 }
  0xc6   :  { %463 = vmatmul.bf16.vlgmr.msra.gmra.mxu3 %v260_v24  ;;  %v257_v25 = vpop.f32.mrf.mxu0 }
  0xc7   :  { %v2070_v25 = vld [vmem:[#allocation12 + $0x30] sm:$0xff] }
  0xc8   :  { %735 = vmatpush.bf16.msrb.mxu2 %v2070_v25  ;;  %767 = vmatpush.bf16.msrb.mxu3 %v2070_v25  ;;  %v2088_v25 = vld [vmem:[#allocation15 + $0x88] sm:$0xf0] }
  0xcc   :  { %736 = vmatpush.bf16.msrb.mxu2 %v2069_v26  ;;  %768 = vmatpush.bf16.msrb.mxu3 %v2069_v26 }
  0xd0   :  { %737 = vmatpush.bf16.msrb.mxu2 %v2068_v27  ;;  %769 = vmatpush.bf16.msrb.mxu3 %v2068_v27 }
  0xd4   :  { %738 = vmatpush.bf16.msrb.mxu2 %v2067_v28  ;;  %770 = vmatpush.bf16.msrb.mxu3 %v2067_v28  ;;  %v1865_v28 = vld [vmem:[#allocation15 + $0x60] sm:$0xf] }
  0xd8   :  { %739 = vmatpush.bf16.msrb.mxu2 %v2066_v30  ;;  %771 = vmatpush.bf16.msrb.mxu3 %v2066_v30  ;;  %v2083_v30 = vld [vmem:[#allocation15 + $0x64] sm:$0xf] }
  0xdc   :  { %740 = vmatpush.bf16.msrb.mxu2 %v2065_v37  ;;  %772 = vmatpush.bf16.msrb.mxu3 %v2065_v37  ;;  %v1853_v37 = vld [vmem:[#allocation15 + $0x48] sm:$0xf] }
  0xe0   :  { %741 = vmatpush.bf16.msrb.mxu2 %v2064_v38  ;;  %773 = vmatpush.bf16.msrb.mxu3 %v2064_v38  ;;  %v2081_v38 = vld [vmem:[#allocation15 + $0x50] sm:$0xf0] }
 0x142   :  { %v438_v9 = vpop.f32.mrf.mxu1 }
 0x143   :  { %v439_v10 = vadd.f32 %v438_v9, %v295_v7 }
 0x145   :  { %v468_v11 = vmax.f32 %v439_v10, 0.0  ;;  %v1889_v10 = vld [vmem:[#allocation15 + $0x90] sm:$0xf] }
 0x147   :  { %472 = vst.msk [vmem:[#allocation2] sm:$0x3] %vm471_vm2, %v468_v11  ;;  %v2090_v11 = vld [vmem:[#allocation15 + $0x98] sm:$0xf0] }
 0x148   :  { %v451_v14 = vpop.f32.mrf.mxu2 }
 0x149   :  { %v452_v15 = vadd.f32 %v451_v14, %v296_v12  ;;  %v464_v16 = vpop.f32.mrf.mxu3  ;;  %v2089_v12 = vld [vmem:[#allocation15 + $0x94] sm:$0xf]  ;;  %v1891_v14 = vld [vmem:[#allocation15 + $0x9c] sm:$0xf0] }
 0x14a   :  { %v465_v17 = vadd.f32 %v464_v16, %v297_v13  ;;  %v440_v18 = vpop.f32.mrf.mxu1  ;;  %v1890_v13 = vor.u32 %v2090_v11, %v1889_v10  ;;  %v2091_v16 = vld [vmem:[#allocation15 + $0xa0] sm:$0xf0] }
 0x14b   :  { %v469_v19 = vmax.f32 %v452_v15, 0.0  ;;  %v1897_v15 = vld [vmem:[#allocation15 + $0x98] sm:$0xf] }
 0x14c   :  { %v470_v20 = vmax.f32 %v465_v17, 0.0  ;;  %v1894_v17 = vor.u32 %v2089_v12, %v1891_v14  ;;  %v1898_v18 = vor.u32 %v2091_v16, %v1897_v15 }
 0x14d   :  { %473 = vst.msk [vmem:[#allocation2 + $0x2] sm:$0x3] %vm471_vm2, %v469_v19  ;;  %v1877_v19 = vld [vmem:[#allocation15 + $0x78] sm:$0xf] }
 0x14e   :  { %474 = vst.msk [vmem:[#allocation2 + $0x4] sm:$0x3] %vm471_vm2, %v470_v20  ;;  %963 = vmatpush.bf16.msra.mxu1 %v1894_v17  ;;  %977 = vmatpush.bf16.msra.mxu2 %v1898_v18  ;;  %v2087_v20 = vld [vmem:[#allocation15 + $0x80] sm:$0xf0]  ;;  %vm1402_vm2 = vcmask 224258  }
 0x150   :  { %v453_v21 = vpop.f32.mrf.mxu2 }
 0x151   :  { %v466_v22 = vpop.f32.mrf.mxu3  ;;  %v2086_v21 = vld [vmem:[#allocation15 + $0x7c] sm:$0xf] }
 0x152   :  { %v1878_v22 = vor.u32 %v2087_v20, %v1877_v19 }
 0x155   :  { %v475_v23 = vld [vmem:[#allocation2] sm:$0x3f] }
 0x156   :  { %v476_v24 = vpack.c.bf16 %v475_v23, %v475_v23  ;;  %v1879_v23 = vld [vmem:[#allocation15 + $0x84] sm:$0xf0] }
 0x157   :  { %v1882_v26 = vor.u32 %v2086_v21, %v1879_v23  ;;  %v791_v21 = vld [vmem:[%s2916_s8] sm:$0x1] }
 0x158   :  { %1782 = vmatmul.msk.bf16.vlgmr.msrb.gmra.mxu0 %vm597_vm3, %v476_v24  ;;  %1784 = vmatmul.msk.bf16.vlgmr.msrb.gmra.mxu1 %vm597_vm3, %v476_v24 }
 0x159   :  { %949 = vmatpush.bf16.msrb.mxu0 %v1890_v13  ;;  %964 = vmatpush.bf16.msra.mxu1 %v1882_v26 }
 0x15d   :  { %950 = vmatpush.bf16.msrb.mxu0 %v1878_v22 }
 0x168   :  { %1783 = vmatmul.msk.bf16.vlgmr.msra.gmra.mxu0 %vm597_vm3, %v476_v24  ;;  %v1885_v24 = vld [vmem:[#allocation15 + $0x80] sm:$0xf]  ;;  %vm1405_vm3 = vcmask 226308  }
 0x169   :  { %v1886_v27 = vor.u32 %v2088_v25, %v1885_v24  ;;  %v2138_v25 = vld [vmem:[#allocation13] ss:$0 sm:$0xff] }
 0x16b   :  { %978 = vmatpush.bf16.msra.mxu2 %v1886_v27 }
 0x1d5   :  { %v610_v31 = vpop.f32.mrf.mxu0  ;;  %v636_v32 = vpop.f32.mrf.mxu1 }
 0x1d6   :  { %v644_v33 = vadd.f32 %v2137_v29, %v610_v31  ;;  %v650_v34 = vrot.slane %v636_v32, 6  ;;  %v659_v35 = vadd.f32 %v2137_v29, %v636_v32  ;;  %v1867_v32 = vld [vmem:[#allocation15 + $0x6c] sm:$0xf0] }
 0x1d8   :  { %646 = vst.msk [vmem:[#allocation3] sm:$0x3] %vm645_vm4, %v644_v33  ;;  %v652_v36 = vadd.f32 %v650_v34, %v644_v33  ;;  %v1873_v33 = vld [vmem:[#allocation15 + $0x68] sm:$0xf]  ;;  %v2085_v34 = vld [vmem:[#allocation15 + $0x70] sm:$0xf0] }
 0x1d9   :  { %660 = vst.msk [vmem:[#allocation3 + $0x8] sm:$0x30] %vm656_vm5, %v659_v35  ;;  %v1870_v35 = vor.u32 %v2083_v30, %v1867_v32 }
 0x1da   :  { %654 = vst.msk [vmem:[#allocation3 + $0x2] sm:$0xc] %vm653_vm6, %v652_v36 }
 0x1db   :  { %657 = vst.msk [vmem:[#allocation3 + $0x4] sm:$0x30] %vm656_vm5, %v652_v36  ;;  %v1874_v36 = vor.u32 %v2085_v34, %v1873_v33  ;;  %965 = vmatpush.bf16.msra.mxu1 %v1870_v35  ;;  %v2098_v33 = vld [vmem:[#allocation18 + $0x30] sm:$0xff]  ;;  %v2097_v34 = vld [vmem:[#allocation18 + $0x28] sm:$0xff]  ;;  %v2096_v35 = vld [vmem:[#allocation18 + $0x20] sm:$0xff] }
 0x1dc   :  { %1102 = vmatpush.bf16.msra.mxu3 %v2098_v33 }
 0x1dd   :  { %v612_v39 = vpop.f32.mrf.mxu0  ;;  %v638_v40 = vpop.f32.mrf.mxu1  ;;  %979 = vmatpush.bf16.msra.mxu2 %v1874_v36 }
 0x1de   :  { %v2080_v39 = vld [vmem:[#allocation15 + $0x4c] sm:$0xf]  ;;  %v1854_v40 = vor.u32 %v2081_v38, %v1853_v37 }
 0x1e0   :  { %1103 = vmatpush.bf16.msra.mxu3 %v2097_v34 }
 0x1e4   :  { %1104 = vmatpush.bf16.msra.mxu3 %v2096_v35 }
 0x1e5   :  { %v623_v41 = vpop.f32.mrf.mxu0 }
 0x1e6   :  { %v647_v42 = vadd.f32 %v2137_v29, %v623_v41  ;;  %v2084_v29 = vld [vmem:[#allocation15 + $0x68] sm:$0xf0]  ;;  %v1855_v41 = vld [vmem:[#allocation15 + $0x54] sm:$0xf0] }
 0x1e7   :  { %v1866_v31 = vor.u32 %v2084_v29, %v1865_v28 }
 0x1e8   :  { %648 = vst.msk [vmem:[#allocation3 + $0x2] sm:$0x3] %vm645_vm4, %v647_v42 }
 0x1e9   :  { %655 = vst.msk [vmem:[#allocation3 + $0x4] sm:$0xc] %vm653_vm6, %v647_v42  ;;  %951 = vmatpush.bf16.msrb.mxu0 %v1866_v31 }
 0x1ea   :  { %658 = vst.msk [vmem:[#allocation3 + $0x6] sm:$0x30] %vm656_vm5, %v647_v42  ;;  %v1861_v42 = vld [vmem:[#allocation15 + $0x50] sm:$0xf] }
 0x1ed   :  { %v625_v43 = vpop.f32.mrf.mxu0  ;;  %952 = vmatpush.bf16.msrb.mxu0 %v1854_v40 }
 0x1ee   :  { %v2082_v43 = vld [vmem:[#allocation15 + $0x58] sm:$0xf0] }
 0x1f0   :  { %v661_v44 = vld [vmem:[#allocation3] sm:$0xff] }
 0x1f1   :  { %v662_v45 = vld [vmem:[#allocation3 + $0x8] sm:$0x3f]  ;;  %v664_v46 = vsel %vm663_vm7, %v661_v44, 0.0 }
 0x1f2   :  { %v666_v47 = vsel %vm665_vm8, %v662_v45, 0.0 }
 0x1f3   :  { %v667_v48 = vadd.f32 %v666_v47, %v664_v46  ;;  %v1841_v46 = vld [vmem:[#allocation15 + $0x30] sm:$0xf]  ;;  %v2078_v47 = vld [vmem:[#allocation15 + $0x38] sm:$0xf0] }
 0x1f5   :  { %v668_v49 = vrot.slane %v667_v48, 4 }
 0x1f7   :  { %v669_v50 = vadd.f32 %v668_v49, %v667_v48  ;;  %v2077_v48 = vld [vmem:[#allocation15 + $0x34] sm:$0xf]  ;;  %v1842_v49 = vor.u32 %v2078_v47, %v1841_v46 }
 0x1f9   :  { %v670_v51 = vrot.slane %v669_v50, 2  ;;  %953 = vmatpush.bf16.msrb.mxu0 %v1842_v49 }
 0x1fb   :  { %v671_v52 = vadd.f32 %v670_v51, %v669_v50  ;;  %v1843_v50 = vld [vmem:[#allocation15 + $0x3c] sm:$0xf0]  ;;  %v1849_v51 = vld [vmem:[#allocation15 + $0x38] sm:$0xf] }
 0x1fd   :  { %v672_v53 = vrot.slane %v671_v52, 1 }
 0x1ff   :  { %v673_v54 = vadd.f32 %v672_v53, %v671_v52  ;;  %v1846_v52 = vor.u32 %v2077_v48, %v1843_v50  ;;  %v2079_v53 = vld [vmem:[#allocation15 + $0x40] sm:$0xf0]  ;;  %v2092_v50 = vld [vmem:[#allocation18] sm:$0xff] }
 0x201   :  { %v674_v55 = vpack.c.bf16 %v673_v54, %v673_v54  ;;  %v1850_v54 = vor.u32 %v2079_v53, %v1849_v51 }
 0x203   :  { %1813 = vmatmul.msk.bf16.vlgmr.msrb.gmra.mxu2 %vm663_vm7, %v674_v55  ;;  %v1829_v55 = vld [vmem:[#allocation15 + $0x18] sm:$0xf] }
 0x286   :  { %v743_v56 = vpop.f32.mrf.mxu2 }
 0x287   :  { %v747_v57 = vmul.f32 0.010204081, %v743_v56  ;;  %v2075_v56 = vld [vmem:[#allocation15 + $0x20] sm:$0xf0] }
 0x289   :  { %v748_v58 = vperm.slane %v747_v57, 0  ;;  %v2074_v57 = vld [vmem:[#allocation15 + $0x1c] sm:$0xf] }
 0x28b   :  { %v2650_v59 = vsub.f32 %v661_v44, %v748_v58  ;;  %v2652_v60 = vsub.f32 %v662_v45, %v748_v58  ;;  %v1858_v44 = vor.u32 %v2080_v39, %v1855_v41  ;;  %v1862_v45 = vor.u32 %v2082_v43, %v1861_v42  ;;  %v2094_v39 = vld [vmem:[#allocation18 + $0x10] sm:$0xff]  ;;  %v2093_v41 = vld [vmem:[#allocation18 + $0x8] sm:$0xff] }
 0x28c   :  { %v1830_v58 = vor.u32 %v2075_v56, %v1829_v55 }
 0x28d   :  { %v751_v61 = vmul.f32 %v2650_v59, %v2650_v59  ;;  %v752_v62 = vmul.f32 %v2652_v60, %v2652_v60  ;;  %966 = vmatpush.bf16.msra.mxu1 %v1858_v44  ;;  %980 = vmatpush.bf16.msra.mxu2 %v1862_v45 }
 0x28e   :  { %v745_v63 = vpop.f32.mrf.mxu2  ;;  %954 = vmatpush.bf16.msrb.mxu0 %v1830_v58 }
 0x28f   :  { %v753_v0 = vsel %vm663_vm7, %v751_v61, 0.0  ;;  %v754_v1 = vsel %vm665_vm8, %v752_v62, 0.0  ;;  %v1831_v61 = vld [vmem:[#allocation15 + $0x24] sm:$0xf0]  ;;  %v1837_v62 = vld [vmem:[#allocation15 + $0x20] sm:$0xf] }
 0x290   :  { %v755_v2 = vadd.f32 %v754_v1, %v753_v0  ;;  %v2076_v63 = vld [vmem:[#allocation15 + $0x28] sm:$0xf0]  ;;  %v1834_v0 = vor.u32 %v2074_v57, %v1831_v61 }
 0x291   :  { %967 = vmatpush.bf16.msra.mxu1 %v1846_v52  ;;  %981 = vmatpush.bf16.msra.mxu2 %v1850_v54  ;;  %v1838_v1 = vor.u32 %v2076_v63, %v1837_v62 }
 0x292   :  { %v756_v3 = vrot.slane %v755_v2, 4 }
 0x294   :  { %v757_v4 = vadd.f32 %v756_v3, %v755_v2  ;;  %v1817_v2 = vld [vmem:[#allocation15] sm:$0xf]  ;;  %v2072_v3 = vld [vmem:[#allocation15 + $0x8] sm:$0xf0] }
 0x295   :  { %968 = vmatpush.bf16.msra.mxu1 %v1834_v0  ;;  %982 = vmatpush.bf16.msra.mxu2 %v1838_v1 }
 0x296   :  { %v758_v5 = vrot.slane %v757_v4, 2 }
 0x298   :  { %v759_v6 = vadd.f32 %v758_v5, %v757_v4  ;;  %v2071_v4 = vld [vmem:[#allocation15 + $0x4] sm:$0xf]  ;;  %v1818_v5 = vor.u32 %v2072_v3, %v1817_v2 }
 0x29a   :  { %v760_v7 = vrot.slane %v759_v6, 1  ;;  %955 = vmatpush.bf16.msrb.mxu0 %v1818_v5 }
 0x29c   :  { %v761_v8 = vadd.f32 %v760_v7, %v759_v6  ;;  %v1819_v6 = vld [vmem:[#allocation15 + $0xc] sm:$0xf0]  ;;  %v1825_v7 = vld [vmem:[#allocation15 + $0x8] sm:$0xf] }
 0x29e   :  { %v762_v9 = vpack.c.bf16 %v761_v8, %v761_v8  ;;  %v2073_v8 = vld [vmem:[#allocation15 + $0x10] sm:$0xf0]  ;;  %1142 = vmatpush.bf16.msra.mxu0 %v2098_v33 }
 0x29f   :  { %v1826_v10 = vor.u32 %v2073_v8, %v1825_v7 }
 0x2a0   :  { %1814 = vmatmul.msk.bf16.vlgmr.msrb.gmra.mxu3 %vm663_vm7, %v762_v9  ;;  %v1822_v9 = vor.u32 %v2071_v4, %v1819_v6 }
 0x2a1   :  { %983 = vmatpush.bf16.msra.mxu2 %v1826_v10 }
 0x2a2   :  { %969 = vmatpush.bf16.msra.mxu1 %v1822_v9  ;;  %1143 = vmatpush.bf16.msra.mxu0 %v2097_v34 }
 0x2a6   :  { %1144 = vmatpush.bf16.msra.mxu0 %v2096_v35 }
 0x323   :  { %v775_v11 = vpop.f32.mrf.mxu3 }
 0x324   :  { %v779_v12 = vmul.f32 0.010204081, %v775_v11 }
 0x326   :  { %v780_v13 = vadd.f32 1e-05, %v779_v12 }
 0x328   :  { %2142 = vrsqrt.f32 %v780_v13  ;;  %vm787_vm10 = vweird.f32 %v780_v13 }
 0x32b   :  { %v777_v14 = vpop.f32.mrf.mxu3 }
 0x32e   :  { %v2143_v15 = vpop.eup %2142 }
 0x32f   :  { %v782_v16 = vmul.f32 %v2143_v15, %v780_v13  ;;  %vm788_vm9 = vweird.f32 %v2143_v15 }
 0x330   :  { %vm789_vm11 = vmor %vm787_vm10, %vm788_vm9 }
 0x331   :  { %v783_v17 = vmul.f32 %v2143_v15, %v782_v16 }
 0x333   :  { %v784_v18 = vmul.f32 0.5, %v783_v17 }
 0x335   :  { %v785_v19 = vsub.f32 1.5, %v784_v18 }
 0x337   :  { %v786_v20 = vmul.f32 %v2143_v15, %v785_v19 }
 0x339   :  { %v790_v22 = vsel %vm789_vm11, %v2143_v15, %v786_v20 }
 0x33a   :  { %v792_v23 = vmul.f32 %v791_v21, %v790_v22 }
 0x33c   :  { %v793_v24 = vperm.slane %v792_v23, 0 }
 0x33e   :  { %v794_v26 = vmul.f32 %v793_v24, %v2650_v59  ;;  %v795_v27 = vmul.f32 %v793_v24, %v2652_v60  ;;  %v2139_v59 = vld [vmem:[#allocation16] ss:$0 sm:$0xff] }
 0x33f   :  { %v2095_v60 = vld [vmem:[#allocation18 + $0x18] sm:$0xff] }
 0x340   :  { %v800_v28 = vadd.f32 %v2138_v25, %v794_v26  ;;  %v801_v29 = vadd.f32 %v2138_v25, %v795_v27  ;;  %1105 = vmatpush.bf16.msra.mxu3 %v2095_v60  ;;  %1145 = vmatpush.bf16.msra.mxu0 %v2095_v60  ;;  %v2006_v60 = vld [vmem:[#allocation21 + $0x90] sm:$0xf] }
 0x342   :  { %v802_v30 = vmax.f32 %v800_v28, 0.0  ;;  %v803_v31 = vmax.f32 %v801_v29, 0.0 }
 0x344   :  { %v804_v32 = vpack.c.bf16 %v803_v31, %v802_v30  ;;  %1106 = vmatpush.bf16.msra.mxu3 %v2094_v39  ;;  %1146 = vmatpush.bf16.msra.mxu0 %v2094_v39  ;;  %v2008_v39 = vld [vmem:[#allocation21 + $0x9c] sm:$0xf0] }
 0x346   :  { %1899 = vmatmul.msk.bf16.vlgmr.msrb.gmra.mxu0 %vm663_vm7, %v804_v32  ;;  %1900 = vmatmul.msk.bf16.vlgmr.msra.gmra.mxu1 %vm663_vm7, %v804_v32 }
 0x347   :  { %1901 = vmatmul.msk.bf16.vlgmr.msra.gmra.mxu2 %vm663_vm7, %v804_v32 }
 0x348   :  { %1107 = vmatpush.bf16.msra.mxu3 %v2093_v41  ;;  %1147 = vmatpush.bf16.msra.mxu0 %v2093_v41  ;;  %v2119_v41 = vld [vmem:[#allocation21 + $0xa0] sm:$0xf0] }
 0x34c   :  { %1108 = vmatpush.bf16.msra.mxu3 %v2092_v50  ;;  %1148 = vmatpush.bf16.msra.mxu0 %v2092_v50  ;;  %v2116_v50 = vld [vmem:[#allocation21 + $0x88] sm:$0xf0] }
 0x3c3   :  { %v957_v36 = vpop.f32.mrf.mxu0  ;;  %v971_v37 = vpop.f32.mrf.mxu1 }
 0x3c4   :  { %v994_v38 = vadd.f32 %v2139_v59, %v971_v37  ;;  %v996_v42 = vadd.f32 %v2139_v59, %v957_v36  ;;  %v2118_v36 = vld [vmem:[#allocation21 + $0x98] sm:$0xf0]  ;;  %v2117_v37 = vld [vmem:[#allocation21 + $0x94] sm:$0xf] }
 0x3c6   :  { %995 = vst.msk [vmem:[#allocation4] sm:$0x3] %vm645_vm4, %v994_v38 }
 0x3c7   :  { %1002 = vst.msk [vmem:[#allocation4 + $0x2] sm:$0xc] %vm653_vm6, %v994_v38 }
 0x3c8   :  { %1004 = vst.msk [vmem:[#allocation4 + $0x4] sm:$0x30] %vm656_vm5, %v994_v38 }
 0x3c9   :  { %1007 = vst.msk [vmem:[#allocation4 + $0x6] sm:$0xc0] %vm1005_vm12, %v994_v38  ;;  %v2007_v38 = vor.u32 %v2118_v36, %v2006_v60 }
 0x3ca   :  { %v985_v40 = vpop.f32.mrf.mxu2 }
 0x3cb   :  { %v998_v43 = vrot.slane %v985_v40, 6  ;;  %v959_v44 = vpop.f32.mrf.mxu0  ;;  %v973_v45 = vpop.f32.mrf.mxu1  ;;  %v2014_v40 = vld [vmem:[#allocation21 + $0x98] sm:$0xf]  ;;  %1334 = vmatpush.bf16.msrb.mxu1 %v2007_v38 }
 0x3cc   :  { %v1008_v46 = vadd.f32 %v2139_v59, %v959_v44  ;;  %v1011_v47 = vadd.f32 %v2139_v59, %v973_v45  ;;  %v1994_v44 = vld [vmem:[#allocation21 + $0x78] sm:$0xf]  ;;  %v2115_v45 = vld [vmem:[#allocation21 + $0x80] sm:$0xf0] }
 0x3cd   :  { %v1000_v48 = vadd.f32 %v998_v43, %v996_v42  ;;  %v2011_v42 = vor.u32 %v2117_v37, %v2008_v39 }
 0x3ce   :  { %v1009_v49 = vadd.f32 %v1008_v46, %v998_v43  ;;  %1012 = vst.msk [vmem:[#allocation4 + $0x10] sm:$0x3] %vm645_vm4, %v1011_v47  ;;  %v2015_v43 = vor.u32 %v2119_v41, %v2014_v40 }
 0x3cf   :  { %1001 = vst.msk [vmem:[#allocation4] sm:$0xc] %vm653_vm6, %v1000_v48  ;;  %1353 = vmatpush.bf16.msrb.mxu2 %v2011_v42 }
 0x3d0   :  { %1003 = vst.msk [vmem:[#allocation4 + $0x2] sm:$0x30] %vm656_vm5, %v1000_v48  ;;  %1372 = vmatpush.bf16.msrb.mxu3 %v2015_v43 }
 0x3d1   :  { %1006 = vst.msk [vmem:[#allocation4 + $0x4] sm:$0xc0] %vm1005_vm12, %v1000_v48  ;;  %v1996_v48 = vld [vmem:[#allocation21 + $0x84] sm:$0xf0] }
 0x3d2   :  { %1010 = vst.msk [vmem:[#allocation4 + $0xe] sm:$0x3] %vm645_vm4, %v1009_v49  ;;  %v987_v51 = vpop.f32.mrf.mxu2  ;;  %v2002_v49 = vld [vmem:[#allocation21 + $0x80] sm:$0xf]  ;;  %vm1408_vm4 = vcmask 228358  }
 0x3d3   :  { %1018 = vst.msk [vmem:[#allocation4 + $0x12] sm:$0xc] %vm653_vm6, %v1011_v47  ;;  %v1014_v52 = vrot.slane %v987_v51, 6  ;;  %v1021_v53 = vadd.f32 %v2139_v59, %v987_v51 }
 0x3d4   :  { %1020 = vst.msk [vmem:[#allocation4 + $0x14] sm:$0x30] %vm656_vm5, %v1011_v47  ;;  %v1995_v47 = vor.u32 %v2115_v45, %v1994_v44 }
 0x3d5   :  { %v1016_v54 = vadd.f32 %v1014_v52, %v1008_v46  ;;  %1022 = vst.msk [vmem:[#allocation4 + $0x16] sm:$0x30] %vm656_vm5, %v1021_v53  ;;  %v2114_v46 = vld [vmem:[#allocation21 + $0x7c] sm:$0xf]  ;;  %v2003_v52 = vor.u32 %v2116_v50, %v2002_v49  ;;  %v1982_v53 = vld [vmem:[#allocation21 + $0x60] sm:$0xf] }
 0x3d6   :  { %v1999_v51 = vor.u32 %v2114_v46, %v1996_v48  ;;  %1335 = vmatpush.bf16.msrb.mxu1 %v1995_v47  ;;  %v1166_v48 = vld [vmem:[%s2921_s13] sm:$0x1] }
 0x3d7   :  { %1017 = vst.msk [vmem:[#allocation4 + $0x10] sm:$0xc] %vm653_vm6, %v1016_v54  ;;  %v1023_v56 = vld [vmem:[#allocation4] sm:$0xff]  ;;  %1373 = vmatpush.bf16.msrb.mxu3 %v2003_v52  ;;  %v2140_v52 = vld [vmem:[#allocation19] ss:$0 sm:$0xff]  ;;  %vm1594_vm6 = vcmask 228352  }
 0x3d8   :  { %1019 = vst.msk [vmem:[#allocation4 + $0x12] sm:$0x30] %vm656_vm5, %v1016_v54  ;;  %v1027_v58 = vsel %vm663_vm7, %v1023_v56, 0.0  ;;  %1354 = vmatpush.bf16.msrb.mxu2 %v1999_v51  ;;  %v2112_v54 = vld [vmem:[#allocation21 + $0x68] sm:$0xf0] }
 0x3d9   :  { %v1024_v55 = vld [vmem:[#allocation4 + $0x8] sm:$0xff] }
 0x3da   :  { %v1028_v57 = vsel %vm663_vm7, %v1024_v55, 0.0 }
 0x3db   :  { %v1029_v63 = vadd.f32 %v1028_v57, %v1027_v58  ;;  %v1984_v57 = vld [vmem:[#allocation21 + $0x6c] sm:$0xf0]  ;;  %v1990_v58 = vld [vmem:[#allocation21 + $0x68] sm:$0xf] }
 0x3dc   :  { %v1026_v62 = vld [vmem:[#allocation4 + $0x18] sm:$0xf] }
 0x3dd   :  { %v1033_v2 = vsel %vm1032_vm13, %v1026_v62, 0.0 }
 0x3df   :  { %v1025_v61 = vld [vmem:[#allocation4 + $0x10] sm:$0xff] }
 0x3e0   :  { %v1030_v0 = vsel %vm663_vm7, %v1025_v61, 0.0 }
 0x3e1   :  { %v1031_v1 = vadd.f32 %v1030_v0, %v1029_v63  ;;  %v1970_v0 = vld [vmem:[#allocation21 + $0x48] sm:$0xf] }
 0x3e3   :  { %v1034_v3 = vadd.f32 %v1033_v2, %v1031_v1  ;;  %v2109_v1 = vld [vmem:[#allocation21 + $0x50] sm:$0xf0]  ;;  %v2108_v2 = vld [vmem:[#allocation21 + $0x4c] sm:$0xf] }
 0x3e5   :  { %v1035_v4 = vrot.slane %v1034_v3, 4 }
 0x3e7   :  { %v1036_v5 = vadd.f32 %v1035_v4, %v1034_v3  ;;  %v1971_v3 = vor.u32 %v2109_v1, %v1970_v0  ;;  %v1972_v4 = vld [vmem:[#allocation21 + $0x54] sm:$0xf0] }
 0x3e9   :  { %v1037_v6 = vrot.slane %v1036_v5, 2 }
 0x3eb   :  { %v1038_v7 = vadd.f32 %v1037_v6, %v1036_v5  ;;  %v1978_v5 = vld [vmem:[#allocation21 + $0x50] sm:$0xf]  ;;  %v1975_v6 = vor.u32 %v2108_v2, %v1972_v4  ;;  %v2722_v4 = vld [vmem:[#allocation22] ss:$0 sm:$0xff] }
 0x3ed   :  { %v1039_v8 = vrot.slane %v1038_v7, 1 }
 0x3ef   :  { %v1040_v9 = vadd.f32 %v1039_v8, %v1038_v7  ;;  %v2110_v7 = vld [vmem:[#allocation21 + $0x58] sm:$0xf0] }
 0x3f0   :  { %v1979_v8 = vor.u32 %v2110_v7, %v1978_v5 }
 0x3f1   :  { %v1041_v10 = vpack.c.bf16 %v1040_v9, %v1040_v9  ;;  %v1958_v9 = vld [vmem:[#allocation21 + $0x30] sm:$0xf] }
 0x3f3   :  { %1930 = vmatmul.msk.bf16.vlgmr.msra.gmra.mxu3 %vm663_vm7, %v1041_v10  ;;  %v2106_v10 = vld [vmem:[#allocation21 + $0x38] sm:$0xf0] }
 0x476   :  { %v1110_v11 = vpop.f32.mrf.mxu3 }
 0x477   :  { %v1114_v12 = vmul.f32 0.0025510204, %v1110_v11  ;;  %v2105_v11 = vld [vmem:[#allocation21 + $0x34] sm:$0xf] }
 0x479   :  { %v1115_v13 = vperm.slane %v1114_v12, 0  ;;  %v1959_v12 = vor.u32 %v2106_v10, %v1958_v9 }
 0x47b   :  { %v2688_v14 = vsub.f32 %v1023_v56, %v1115_v13  ;;  %v2690_v15 = vsub.f32 %v1024_v55, %v1115_v13  ;;  %v2692_v16 = vsub.f32 %v1025_v61, %v1115_v13  ;;  %v2694_v17 = vsub.f32 %v1026_v62, %v1115_v13  ;;  %v2111_v55 = vld [vmem:[#allocation21 + $0x64] sm:$0xf]  ;;  %v2113_v61 = vld [vmem:[#allocation21 + $0x70] sm:$0xf0]  ;;  %v1960_v13 = vld [vmem:[#allocation21 + $0x3c] sm:$0xf0] }
 0x47c   :  { %v1983_v56 = vor.u32 %v2112_v54, %v1982_v53  ;;  %v1987_v62 = vor.u32 %v2111_v55, %v1984_v57  ;;  %v1991_v63 = vor.u32 %v2113_v61, %v1990_v58 }
 0x47d   :  { %v1120_v18 = vmul.f32 %v2688_v14, %v2688_v14  ;;  %v1121_v19 = vmul.f32 %v2690_v15, %v2690_v15  ;;  %v1122_v20 = vmul.f32 %v2692_v16, %v2692_v16  ;;  %v1123_v22 = vmul.f32 %v2694_v17, %v2694_v17 }
 0x47e   :  { %v1112_v21 = vpop.f32.mrf.mxu3  ;;  %1336 = vmatpush.bf16.msrb.mxu1 %v1983_v56  ;;  %1355 = vmatpush.bf16.msrb.mxu2 %v1987_v62 }
 0x47f   :  { %v1124_v23 = vsel %vm663_vm7, %v1120_v18, 0.0  ;;  %v1125_v24 = vsel %vm663_vm7, %v1121_v19, 0.0  ;;  %v1127_v26 = vsel %vm663_vm7, %v1122_v20, 0.0  ;;  %v1129_v28 = vsel %vm1032_vm13, %v1123_v22, 0.0  ;;  %1374 = vmatpush.bf16.msrb.mxu3 %v1991_v63  ;;  %v1966_v18 = vld [vmem:[#allocation21 + $0x38] sm:$0xf] }
 0x480   :  { %v1126_v25 = vadd.f32 %v1125_v24, %v1124_v23  ;;  %v2107_v19 = vld [vmem:[#allocation21 + $0x40] sm:$0xf0]  ;;  %v1963_v20 = vor.u32 %v2105_v11, %v1960_v13  ;;  %v1946_v22 = vld [vmem:[#allocation21 + $0x18] sm:$0xf]  ;;  %v2102_v24 = vld [vmem:[#allocation21 + $0x1c] sm:$0xf] }
 0x481   :  { %v1967_v21 = vor.u32 %v2107_v19, %v1966_v18  ;;  %v2103_v23 = vld [vmem:[#allocation21 + $0x20] sm:$0xf0] }
 0x482   :  { %v1128_v27 = vadd.f32 %v1127_v26, %v1126_v25  ;;  %1337 = vmatpush.bf16.msrb.mxu1 %v1971_v3  ;;  %1356 = vmatpush.bf16.msrb.mxu2 %v1975_v6  ;;  %v1947_v25 = vor.u32 %v2103_v23, %v1946_v22  ;;  %v1948_v26 = vld [vmem:[#allocation21 + $0x24] sm:$0xf0] }
 0x483   :  { %1375 = vmatpush.bf16.msrb.mxu3 %v1979_v8 }
 0x484   :  { %v1130_v29 = vadd.f32 %v1129_v28, %v1128_v27  ;;  %v1954_v27 = vld [vmem:[#allocation21 + $0x20] sm:$0xf]  ;;  %v2104_v28 = vld [vmem:[#allocation21 + $0x28] sm:$0xf0] }
 0x486   :  { %v1131_v30 = vrot.slane %v1130_v29, 4  ;;  %1338 = vmatpush.bf16.msrb.mxu1 %v1959_v12  ;;  %1357 = vmatpush.bf16.msrb.mxu2 %v1963_v20 }
 0x487   :  { %1376 = vmatpush.bf16.msrb.mxu3 %v1967_v21 }
 0x488   :  { %v1132_v31 = vadd.f32 %v1131_v30, %v1130_v29  ;;  %v1951_v29 = vor.u32 %v2102_v24, %v1948_v26  ;;  %v1934_v30 = vld [vmem:[#allocation21] sm:$0xf] }
 0x48a   :  { %v1133_v32 = vrot.slane %v1132_v31, 2  ;;  %1339 = vmatpush.bf16.msrb.mxu1 %v1947_v25  ;;  %1358 = vmatpush.bf16.msrb.mxu2 %v1951_v29 }
 0x48c   :  { %v1134_v33 = vadd.f32 %v1133_v32, %v1132_v31  ;;  %v2100_v31 = vld [vmem:[#allocation21 + $0x8] sm:$0xf0]  ;;  %v1955_v32 = vor.u32 %v2104_v28, %v1954_v27 }
 0x48d   :  { %v1935_v36 = vor.u32 %v2100_v31, %v1934_v30 }
 0x48e   :  { %v1135_v34 = vrot.slane %v1134_v33, 1  ;;  %1377 = vmatpush.bf16.msrb.mxu3 %v1955_v32 }
 0x48f   :  { %1340 = vmatpush.bf16.msrb.mxu1 %v1935_v36 }
 0x490   :  { %v1136_v35 = vadd.f32 %v1135_v34, %v1134_v33  ;;  %v2099_v33 = vld [vmem:[#allocation21 + $0x4] sm:$0xf]  ;;  %v1936_v34 = vld [vmem:[#allocation21 + $0xc] sm:$0xf0] }
 0x491   :  { %v1939_v38 = vor.u32 %v2099_v33, %v1936_v34 }
 0x492   :  { %v1137_v59 = vpack.c.bf16 %v1136_v35, %v1136_v35  ;;  %v1942_v35 = vld [vmem:[#allocation21 + $0x8] sm:$0xf] }
 0x493   :  { %1359 = vmatpush.bf16.msrb.mxu2 %v1939_v38 }
 0x494   :  { %1931 = vmatmul.msk.bf16.vlgmr.msra.gmra.mxu0 %vm663_vm7, %v1137_v59  ;;  %v2101_v59 = vld [vmem:[#allocation21 + $0x10] sm:$0xf0] }
 0x495   :  { %v1943_v39 = vor.u32 %v2101_v59, %v1942_v35 }
 0x497   :  { %1378 = vmatpush.bf16.msrb.mxu3 %v1943_v39 }
 0x511   :  { %v1150_v60 = vpop.f32.mrf.mxu0 }
 0x512   :  { %v1154_v37 = vmul.f32 0.0025510204, %v1150_v60 }
 0x514   :  { %v1155_v40 = vadd.f32 1e-05, %v1154_v37 }
 0x516   :  { %2144 = vrsqrt.f32 %v1155_v40  ;;  %vm1162_vm15 = vweird.f32 %v1155_v40 }
 0x519   :  { %v1152_v41 = vpop.f32.mrf.mxu0 }
 0x51c   :  { %v2145_v42 = vpop.eup %2144 }
 0x51d   :  { %v1157_v43 = vmul.f32 %v2145_v42, %v1155_v40  ;;  %vm1163_vm14 = vweird.f32 %v2145_v42 }
 0x51e   :  { %vm1164_vm0 = vmor %vm1162_vm15, %vm1163_vm14 }
 0x51f   :  { %v1158_v44 = vmul.f32 %v2145_v42, %v1157_v43 }
 0x521   :  { %v1159_v45 = vmul.f32 0.5, %v1158_v44 }
 0x523   :  { %v1160_v46 = vsub.f32 1.5, %v1159_v45 }
 0x525   :  { %v1161_v47 = vmul.f32 %v2145_v42, %v1160_v46 }
 0x527   :  { %v1165_v49 = vsel %vm1164_vm0, %v2145_v42, %v1161_v47 }
 0x528   :  { %v1167_v50 = vmul.f32 %v1166_v48, %v1165_v49 }
 0x52a   :  { %v1168_v51 = vperm.slane %v1167_v50, 0 }
 0x52c   :  { %v1169_v53 = vmul.f32 %v1168_v51, %v2688_v14  ;;  %v1170_v54 = vmul.f32 %v1168_v51, %v2690_v15  ;;  %v1171_v62 = vmul.f32 %v1168_v51, %v2692_v16  ;;  %v1172_v63 = vmul.f32 %v1168_v51, %v2694_v17 }
 0x52e   :  { %v1177_v55 = vadd.f32 %v2140_v52, %v1169_v53  ;;  %v1178_v56 = vadd.f32 %v2140_v52, %v1170_v54  ;;  %v1179_v0 = vadd.f32 %v2140_v52, %v1171_v62  ;;  %v1180_v1 = vadd.f32 %v2140_v52, %v1172_v63 }
 0x530   :  { %v1181_v57 = vmax.f32 %v1177_v55, 0.0  ;;  %v1182_v58 = vmax.f32 %v1178_v56, 0.0  ;;  %v1183_v14 = vmax.f32 %v1179_v0, 0.0  ;;  %v1184_v2 = vmax.f32 %v1180_v1, 0.0 }
 0x532   :  { %v1185_v61 = vpack.c.bf16 %v1182_v58, %v1181_v57  ;;  %v1186_v15 = vpack.c.bf16 %v1184_v2, %v1183_v14 }
 0x534   :  { %2016 = vmatmul.msk.bf16.vlgmr.msrb.gmra.mxu1 %vm663_vm7, %v1185_v61  ;;  %2018 = vmatmul.msk.bf16.vlgmr.msrb.gmra.mxu2 %vm663_vm7, %v1185_v61 }
 0x535   :  { %2020 = vmatmul.msk.bf16.vlgmr.msrb.gmra.mxu3 %vm663_vm7, %v1185_v61 }
 0x544   :  { %2017 = vmatmul.msk.bf16.gmra.mxu1 %vm663_vm7, %v1186_v15  ;;  %2019 = vmatmul.msk.bf16.gmra.mxu2 %vm663_vm7, %v1186_v15 }
 0x545   :  { %2021 = vmatmul.msk.bf16.gmra.mxu3 %vm663_vm7, %v1186_v15 }
 0x5b1   :  { %v1342_v3 = vpop.f32.mrf.mxu1 }
 0x5b2   :  { %v1397_v6 = vadd.f32 %v2722_v4, %v1342_v3 }
 0x5b7   :  { %v1361_v5 = vpop.f32.mrf.mxu2 }
 0x5b8   :  { %v1394_v16 = vadd.f32 %v2722_v4, %v1361_v5  ;;  %v1380_v17 = vpop.f32.mrf.mxu3 }
 0x5b9   :  { %v1399_v7 = vrot.slane %v1380_v17, 6  ;;  %v1344_v8 = vpop.f32.mrf.mxu1 }
 0x5ba   :  { %1396 = vst.msk [vmem:[%s2925_s17] sm:$0x3] %vm1395_vm1, %v1394_v16  ;;  %v1411_v9 = vadd.f32 %v2722_v4, %v1344_v8 }
 0x5bb   :  { %1404 = vst.msk [vmem:[%s2925_s17 + $0x2] sm:$0xc] %vm1402_vm2, %v1394_v16  ;;  %v1401_v10 = vadd.f32 %v1399_v7, %v1397_v6 }
 0x5bc   :  { %1407 = vst.msk [vmem:[%s2925_s17 + $0x4] sm:$0x30] %vm1405_vm3, %v1394_v16  ;;  %v1412_v11 = vadd.f32 %v1411_v9, %v1399_v7 }
 0x5bd   :  { %1410 = vst.msk [vmem:[%s2925_s17 + $0x6] sm:$0xc0] %vm1408_vm4, %v1394_v16 }
 0x5be   :  { %1403 = vst.msk [vmem:[%s2925_s17] sm:$0xc] %vm1402_vm2, %v1401_v10 }
 0x5bf   :  { %1406 = vst.msk [vmem:[%s2925_s17 + $0x2] sm:$0x30] %vm1405_vm3, %v1401_v10  ;;  %v1363_v12 = vpop.f32.mrf.mxu2 }
 0x5c0   :  { %1409 = vst.msk [vmem:[%s2925_s17 + $0x4] sm:$0xc0] %vm1408_vm4, %v1401_v10  ;;  %v1414_v13 = vadd.f32 %v2722_v4, %v1363_v12  ;;  %v1382_v18 = vpop.f32.mrf.mxu3 }
 0x5c1   :  { %1413 = vst.msk [vmem:[%s2925_s17 + $0xe] sm:$0x3] %vm1395_vm1, %v1412_v11  ;;  %v1417_v19 = vrot.slane %v1382_v18, 6  ;;  %v1347_v20 = vpop.f32.mrf.mxu1 }
 0x5c2   :  { %1415 = vst.msk [vmem:[%s2925_s17 + $0x10] sm:$0x3] %vm1395_vm1, %v1414_v13  ;;  %v1426_v21 = vadd.f32 %v2722_v4, %v1347_v20 }
 0x5c3   :  { %1421 = vst.msk [vmem:[%s2925_s17 + $0x12] sm:$0xc] %vm1402_vm2, %v1414_v13  ;;  %v1419_v22 = vadd.f32 %v1417_v19, %v1411_v9 }
 0x5c4   :  { %1423 = vst.msk [vmem:[%s2925_s17 + $0x14] sm:$0x30] %vm1405_vm3, %v1414_v13  ;;  %v1427_v23 = vadd.f32 %v1426_v21, %v1417_v19 }
 0x5c5   :  { %1425 = vst.msk [vmem:[%s2925_s17 + $0x16] sm:$0xc0] %vm1408_vm4, %v1414_v13 }
 0x5c6   :  { %v1454_v24 = vld [vmem:[%s2925_s17] sm:$0xff]  ;;  %1420 = vst.msk [vmem:[%s2925_s17 + $0x10] sm:$0xc] %vm1402_vm2, %v1419_v22 }
 0x5c7   :  { %v1461_v25 = vsub.f32 0.0, %v1454_v24  ;;  %1422 = vst.msk [vmem:[%s2925_s17 + $0x12] sm:$0x30] %vm1405_vm3, %v1419_v22  ;;  %v1366_v26 = vpop.f32.mrf.mxu2 }
 0x5c8   :  { %v1455_v27 = vld [vmem:[%s2925_s17 + $0x8] sm:$0xff]  ;;  %1424 = vst.msk [vmem:[%s2925_s17 + $0x14] sm:$0xc0] %vm1408_vm4, %v1419_v22  ;;  %v1429_v28 = vadd.f32 %v2722_v4, %v1366_v26  ;;  %v1385_v29 = vpop.f32.mrf.mxu3 }
 0x5c9   :  { %v1468_v30 = vmul.f32 1.442695, %v1461_v25  ;;  %v1462_v31 = vsub.f32 0.0, %v1455_v27  ;;  %1428 = vst.msk [vmem:[%s2925_s17 + $0x1e] sm:$0x3] %vm1395_vm1, %v1427_v23  ;;  %v1432_v32 = vrot.slane %v1385_v29, 6  ;;  %v1349_v33 = vpop.f32.mrf.mxu1 }
 0x5ca   :  { %1430 = vst.msk [vmem:[%s2925_s17 + $0x20] sm:$0x3] %vm1395_vm1, %v1429_v28  ;;  %v1441_v34 = vadd.f32 %v2722_v4, %v1349_v33 }
 0x5cb   :  { %2146 = vpow2.f32 %v1468_v30  ;;  %v1470_v35 = vmul.f32 1.442695, %v1462_v31  ;;  %1436 = vst.msk [vmem:[%s2925_s17 + $0x22] sm:$0xc] %vm1402_vm2, %v1429_v28  ;;  %v1434_v59 = vadd.f32 %v1432_v32, %v1426_v21 }
 0x5cc   :  { %1438 = vst.msk [vmem:[%s2925_s17 + $0x24] sm:$0x30] %vm1405_vm3, %v1429_v28  ;;  %v1442_v60 = vadd.f32 %v1441_v34, %v1432_v32 }
 0x5cd   :  { %2148 = vpow2.f32 %v1470_v35  ;;  %1440 = vst.msk [vmem:[%s2925_s17 + $0x26] sm:$0xc0] %vm1408_vm4, %v1429_v28 }
 0x5ce   :  { %v1456_v36 = vld [vmem:[%s2925_s17 + $0x10] sm:$0xff]  ;;  %1435 = vst.msk [vmem:[%s2925_s17 + $0x20] sm:$0xc] %vm1402_vm2, %v1434_v59 }
 0x5cf   :  { %v1463_v37 = vsub.f32 0.0, %v1456_v36  ;;  %1437 = vst.msk [vmem:[%s2925_s17 + $0x22] sm:$0x30] %vm1405_vm3, %v1434_v59  ;;  %v1368_v38 = vpop.f32.mrf.mxu2 }
 0x5d0   :  { %v1457_v39 = vld [vmem:[%s2925_s17 + $0x18] sm:$0xff]  ;;  %1439 = vst.msk [vmem:[%s2925_s17 + $0x24] sm:$0xc0] %vm1408_vm4, %v1434_v59  ;;  %v1444_v40 = vadd.f32 %v2722_v4, %v1368_v38  ;;  %v1387_v41 = vpop.f32.mrf.mxu3 }
 0x5d1   :  { %v2147_v42 = vpop.eup %2146  ;;  %v1472_v43 = vmul.f32 1.442695, %v1463_v37  ;;  %v1464_v44 = vsub.f32 0.0, %v1457_v39  ;;  %1443 = vst.msk [vmem:[%s2925_s17 + $0x2e] sm:$0x3] %vm1395_vm1, %v1442_v60  ;;  %v1447_v45 = vrot.slane %v1387_v41, 6  ;;  %v1452_v46 = vadd.f32 %v2722_v4, %v1387_v41 }
 0x5d2   :  { %v1482_v47 = vadd.f32 1.0, %v2147_v42  ;;  %1445 = vst.msk [vmem:[%s2925_s17 + $0x30] sm:$0x3] %vm1395_vm1, %v1444_v40 }
 0x5d3   :  { %v2149_v48 = vpop.eup %2148  ;;  %2150 = vpow2.f32 %v1472_v43  ;;  %v1474_v49 = vmul.f32 1.442695, %v1464_v44  ;;  %1451 = vst.msk [vmem:[%s2925_s17 + $0x32] sm:$0xc] %vm1402_vm2, %v1444_v40  ;;  %v1449_v50 = vadd.f32 %v1447_v45, %v1441_v34 }
 0x5d4   :  { %2152 = vrcp.f32 %v1482_v47  ;;  %1453 = vst.msk [vmem:[%s2925_s17 + $0x34] sm:$0xc] %vm1402_vm2, %v1452_v46  ;;  %v1483_v51 = vadd.f32 1.0, %v2149_v48  ;;  %v1500_v0 = vand.u32 2147483648, %v1482_v47  ;;  %v1498_v17 = vand.u32 2147483647, %v1482_v47 }
 0x5d5   :  { %2154 = vpow2.f32 %v1474_v49  ;;  %1450 = vst.msk [vmem:[%s2925_s17 + $0x30] sm:$0xc] %vm1402_vm2, %v1449_v50  ;;  %vm1494_vm7 = vweird.f32 %v1482_v47 }
 0x5d6   :  { %v1458_v52 = vld [vmem:[%s2925_s17 + $0x20] sm:$0xff]  ;;  %2156 = vrcp.f32 %v1483_v51  ;;  %v1501_v9 = vor.u32 1.1754944e-38, %v1500_v0  ;;  %v1515_v10 = vand.u32 2147483648, %v1483_v51  ;;  %v1513_v13 = vand.u32 2147483647, %v1483_v51 }
 0x5d7   :  { %v1465_v53 = vsub.f32 0.0, %v1458_v52  ;;  %vm1499_vm10 = vcmp.eq.f32.partialorder %v1498_v17, 8.507059e+37  ;;  %vm1509_vm11 = vweird.f32 %v1483_v51 }
 0x5d8   :  { %v1459_v54 = vld [vmem:[%s2925_s17 + $0x28] sm:$0xff]  ;;  %v1516_v25 = vor.u32 1.1754944e-38, %v1515_v10  ;;  %vm1514_vm13 = vcmp.eq.f32.partialorder %v1513_v13, 8.507059e+37 }
 0x5d9   :  { %v2151_v55 = vpop.eup %2150  ;;  %v1466_v56 = vsub.f32 0.0, %v1459_v54  ;;  %v1476_v61 = vmul.f32 1.442695, %v1465_v53 }
 0x5da   :  { %v2153_v57 = vpop.eup %2152  ;;  %v2863_v58 = vadd.f32 1.0, %v2151_v55 }
 0x5db   :  { %v2155_v62 = vpop.eup %2154  ;;  %v1490_v63 = vmul.f32 %v2153_v57, %v1482_v47  ;;  %v1478_v1 = vmul.f32 1.442695, %v1466_v56  ;;  %vm1495_vm5 = vweird.f32 %v2153_v57 }
 0x5dc   :  { %2158 = vrcp.f32 %v2863_v58  ;;  %v1460_v14 = vld [vmem:[%s2925_s17 + $0x30] sm:$0xff]  ;;  %v2157_v2 = vpop.eup %2156  ;;  %v2869_v3 = vadd.f32 1.0, %v2155_v62  ;;  %vm1496_vm8 = vmor %vm1494_vm7, %vm1495_vm5  ;;  %v1530_v27 = vand.u32 2147483648, %v2863_v58  ;;  %v1528_v33 = vand.u32 2147483647, %v2863_v58 }
 0x5dd   :  { %v1491_v15 = vsub.f32 1.0, %v1490_v63  ;;  %2160 = vpow2.f32 %v1476_v61  ;;  %v1467_v4 = vsub.f32 0.0, %v1460_v14  ;;  %v1505_v5 = vmul.f32 %v2157_v2, %v1483_v51 }
 0x5de   :  { %2162 = vrcp.f32 %v2869_v3  ;;  %vm1510_vm9 = vweird.f32 %v2157_v2  ;;  %vm1524_vm15 = vweird.f32 %v2863_v58  ;;  %v1531_v36 = vor.u32 1.1754944e-38, %v1530_v27 }
 0x5df   :  { %v1492_v16 = vmul.f32 %v2153_v57, %v1491_v15  ;;  %v1506_v6 = vsub.f32 1.0, %v1505_v5  ;;  %2164 = vpow2.f32 %v1478_v1  ;;  %v1480_v7 = vmul.f32 1.442695, %v1467_v4  ;;  %vm1511_vm12 = vmor %vm1509_vm11, %vm1510_vm9 }
 0x5e0   :  { %v1545_v37 = vand.u32 2147483648, %v2869_v3  ;;  %v1543_v40 = vand.u32 2147483647, %v2869_v3  ;;  %vm1529_vm2 = vcmp.eq.f32.partialorder %v1528_v33, 8.507059e+37  ;;  %vm1539_vm3 = vweird.f32 %v2869_v3 }
 0x5e1   :  { %v1493_v8 = vadd.f32 %v2153_v57, %v1492_v16  ;;  %v1507_v12 = vmul.f32 %v2157_v2, %v1506_v6  ;;  %2166 = vpow2.f32 %v1480_v7 }
 0x5e2   :  { %v2159_v11 = vpop.eup %2158  ;;  %v1546_v45 = vor.u32 1.1754944e-38, %v1545_v37  ;;  %vm1544_vm5 = vcmp.eq.f32.partialorder %v1543_v40, 8.507059e+37 }
 0x5e3   :  { %v2161_v18 = vpop.eup %2160  ;;  %v1497_v19 = vsel %vm1496_vm8, %v2153_v57, %v1493_v8  ;;  %v1520_v20 = vmul.f32 %v2159_v11, %v2863_v58  ;;  %v1508_v22 = vadd.f32 %v2157_v2, %v1507_v12  ;;  %vm1525_vm14 = vweird.f32 %v2159_v11 }
 0x5e4   :  { %v1502_v21 = vsel %vm1499_vm10, %v1501_v9, %v1497_v19  ;;  %v1486_v23 = vadd.f32 1.0, %v2161_v18  ;;  %v2163_v24 = vpop.eup %2162  ;;  %vm1526_vm0 = vmor %vm1524_vm15, %vm1525_vm14 }
 0x5e5   :  { %1595 = vst.msk [vmem:[%s2925_s17] sm:$0xff] %vm1594_vm6, %v1502_v21  ;;  %v1521_v26 = vsub.f32 1.0, %v1520_v20  ;;  %v2165_v28 = vpop.eup %2164  ;;  %v1512_v29 = vsel %vm1511_vm12, %v2157_v2, %v1508_v22  ;;  %v1535_v30 = vmul.f32 %v2163_v24, %v2869_v3  ;;  %vm1540_vm1 = vweird.f32 %v2163_v24 }
 0x5e6   :  { %2168 = vrcp.f32 %v1486_v23  ;;  %v1517_v31 = vsel %vm1514_vm13, %v1516_v25, %v1512_v29  ;;  %v1487_v59 = vadd.f32 1.0, %v2165_v28  ;;  %vm1541_vm4 = vmor %vm1539_vm3, %vm1540_vm1  ;;  %v1558_v50 = vand.u32 2147483647, %v1486_v23 }
 0x5e7   :  { %v1522_v32 = vmul.f32 %v2159_v11, %v1521_v26  ;;  %v2167_v34 = vpop.eup %2166  ;;  %1596 = vst.msk [vmem:[%s2925_s17 + $0x8] sm:$0xff] %vm1594_vm6, %v1517_v31  ;;  %v1536_v35 = vsub.f32 1.0, %v1535_v30  ;;  %v1560_v52 = vand.u32 2147483648, %v1486_v23  ;;  %vm1554_vm8 = vweird.f32 %v1486_v23 }
 0x5e8   :  { %v1488_v38 = vadd.f32 1.0, %v2167_v34  ;;  %2170 = vrcp.f32 %v1487_v59  ;;  %vm1559_vm9 = vcmp.eq.f32.partialorder %v1558_v50, 8.507059e+37  ;;  %v1573_v62 = vand.u32 2147483647, %v1487_v59 }
 0x5e9   :  { %v1523_v60 = vadd.f32 %v2159_v11, %v1522_v32  ;;  %v1537_v39 = vmul.f32 %v2163_v24, %v1536_v35  ;;  %v1561_v61 = vor.u32 1.1754944e-38, %v1560_v52  ;;  %v1575_v63 = vand.u32 2147483648, %v1487_v59 }
 0x5ea   :  { %2172 = vrcp.f32 %v1488_v38  ;;  %v1590_v2 = vand.u32 2147483648, %v1488_v38  ;;  %v1588_v4 = vand.u32 2147483647, %v1488_v38  ;;  %vm1569_vm13 = vweird.f32 %v1487_v59 }
 0x5eb   :  { %v1527_v41 = vsel %vm1526_vm0, %v2159_v11, %v1523_v60  ;;  %v1538_v44 = vadd.f32 %v2163_v24, %v1537_v39  ;;  %v1576_v16 = vor.u32 1.1754944e-38, %v1575_v63  ;;  %vm1584_vm15 = vweird.f32 %v1488_v38 }
 0x5ec   :  { %v2169_v42 = vpop.eup %2168  ;;  %v1532_v43 = vsel %vm1529_vm2, %v1531_v36, %v1527_v41  ;;  %vm1574_vm0 = vcmp.eq.f32.partialorder %v1573_v62, 8.507059e+37  ;;  %v1591_v7 = vor.u32 1.1754944e-38, %v1590_v2  ;;  %vm1589_vm2 = vcmp.eq.f32.partialorder %v1588_v4, 8.507059e+37 }
 0x5ed   :  { %1597 = vst.msk [vmem:[%s2925_s17 + $0x10] sm:$0xff] %vm1594_vm6, %v1532_v43  ;;  %v1550_v46 = vmul.f32 %v2169_v42, %v1486_v23  ;;  %v1542_v47 = vsel %vm1541_vm4, %v2163_v24, %v1538_v44  ;;  %vm1555_vm7 = vweird.f32 %v2169_v42 }
 0x5ee   :  { %v1547_v48 = vsel %vm1544_vm5, %v1546_v45, %v1542_v47  ;;  %v2171_v51 = vpop.eup %2170  ;;  %vm1556_vm10 = vmor %vm1554_vm8, %vm1555_vm7 }
 0x5ef   :  { %v1551_v49 = vsub.f32 1.0, %v1550_v46  ;;  %1598 = vst.msk [vmem:[%s2925_s17 + $0x18] sm:$0xff] %vm1594_vm6, %v1547_v48  ;;  %v1565_v55 = vmul.f32 %v2171_v51, %v1487_v59  ;;  %vm1570_vm11 = vweird.f32 %v2171_v51 }
 0x5f0   :  { %v2173_v53 = vpop.eup %2172  ;;  %vm1571_vm14 = vmor %vm1569_vm13, %vm1570_vm11 }
 0x5f1   :  { %v1552_v54 = vmul.f32 %v2169_v42, %v1551_v49  ;;  %v1580_v56 = vmul.f32 %v2173_v53, %v1488_v38  ;;  %v1566_v58 = vsub.f32 1.0, %v1565_v55  ;;  %vm1585_vm12 = vweird.f32 %v2173_v53 }
 0x5f2   :  { %vm1586_vm1 = vmor %vm1584_vm15, %vm1585_vm12 }
 0x5f3   :  { %v1553_v57 = vadd.f32 %v2169_v42, %v1552_v54  ;;  %v1581_v0 = vsub.f32 1.0, %v1580_v56  ;;  %v1567_v14 = vmul.f32 %v2171_v51, %v1566_v58 }
 0x5f5   :  { %v1557_v1 = vsel %vm1556_vm10, %v2169_v42, %v1553_v57  ;;  %v1582_v3 = vmul.f32 %v2173_v53, %v1581_v0  ;;  %v1568_v5 = vadd.f32 %v2171_v51, %v1567_v14 }
 0x5f6   :  { %v1562_v15 = vsel %vm1559_vm9, %v1561_v61, %v1557_v1 }
 0x5f7   :  { %1599 = vst.msk [vmem:[%s2925_s17 + $0x20] sm:$0xff] %vm1594_vm6, %v1562_v15  ;;  %v1583_v17 = vadd.f32 %v2173_v53, %v1582_v3  ;;  %v1572_v6 = vsel %vm1571_vm14, %v2171_v51, %v1568_v5 }
 0x5f8   :  { %v1577_v8 = vsel %vm1574_vm0, %v1576_v16, %v1572_v6 }
 0x5f9   :  { %v1587_v9 = vsel %vm1586_vm1, %v2173_v53, %v1583_v17  ;;  %1600 = vst.msk [vmem:[%s2925_s17 + $0x28] sm:$0xff] %vm1594_vm6, %v1577_v8 }
 0x5fa   :  { %v1592_v10 = vsel %vm1589_vm2, %v1591_v7, %v1587_v9 }
 0x5fb   :  { %1601 = vst.msk [vmem:[%s2925_s17 + $0x30] sm:$0xff] %vm1594_vm6, %v1592_v10 }
 0x5fc   :  { %1606 = vsyncpa [#allocation6], 1 }
 0x5fd   :  { %1607 = vsyncpa [#allocation8], 1 }
 0x5fe   :  { %1608 = vsyncpa [#allocation11], 1 }
 0x5ff   :  { %1609 = vsyncpa [#allocation14], 1 }
 0x600   :  { %1610 = vsyncpa [#allocation17], 1 }
 0x601   :  { %1611 = vsyncpa [#allocation20], 1 }
 0x602   :  { %1612 = vsyncpa [#allocation23], 1 }

</bundles_post_ra>
